<compile_context>
chip_gen: v7x
topology: tpu7x:2x2x1
jax: 0.10.0
libtpu: 0.0.40
codegen_flags: <defaults>
</compile_context>

<pallas_src>
import math
import jax
import jax.numpy as jnp
from jax.experimental import pallas as pl
from jax.experimental.pallas import tpu as pltpu

_HP = 128  # per-gate lane padding (one full vreg of lanes)


def gru_fc_kernel(x_ref, w_ih_ref, b_g_ref, w_hh_ref, b_hhn_ref, w_fc_ref,
                  b_fc_ref, out_ref):
    """Fused GRU (input proj + recurrence) + last-step Linear, one batch tile.

    x_ref:     [Bt, T, I]   raw input, batch-first (no wrapper transpose/pad)
    w_ih_ref:  [I, 3*Hp]    input->gates weights, gate blocks padded to Hp=128
    b_g_ref:   [1, 3*Hp]    (b_ih + b_hh) for r,z gates; b_ih only for n gate
    w_hh_ref:  [Hp, 3*Hp]   hidden->gates weights, zero padded
    b_hhn_ref: [1, 3*Hp]    b_hh for the n gate only (zeros elsewhere)
    w_fc_ref:  [O, Hp]      fc weight, transposed + zero padded
    b_fc_ref:  [1] in SMEM when O == 1 (else [1, O] in VMEM)
    out_ref:   [Bt, O]
    """
    Bt, T, I = x_ref.shape
    G3 = w_hh_ref.shape[1]
    Hp = G3 // 3
    O = out_ref.shape[1]

    w_ih = w_ih_ref[...]
    w_hh = w_hh_ref[...]          # resident in VMEM across all steps
    b_hhn = b_hhn_ref[...]
    # Hoist the (un-CSE'd) bias broadcast out of the time loop.
    b_g = jnp.broadcast_to(b_g_ref[...], (Bt, G3))

    # h0 = zeros (matches torch.zeros(1, B, H)); padded lanes stay exactly 0
    # throughout the recurrence (zero-padded weights/biases guarantee it).
    h = jnp.zeros((Bt, Hp), dtype=jnp.float32)

    # Static unroll: T=8 is tiny and compile-time known; keeps the whole
    # recurrence visible to the LLO scheduler.
    # TODO(synk): switch to lax.fori_loop(..., unroll=4) with x staged via a
    # time-grid BlockSpec if T grows past ~32-64 steps (vreg pressure).
    for t in range(T):
        xt = x_ref[:, t, :]                                     # [Bt, I]
        # Fused input projection: I=2, so do it as I broadcast mul-adds on the
        # VPU (fills otherwise-idle VALU slots while the serial h@W_hh drains)
        # instead of a K=2 MXU matmul or a precomputed gx in HBM.
        gx = b_g
        for i in range(I):
            gx = gx + xt[:, i:i + 1] * w_ih[i:i + 1, :]          # [Bt, 3*Hp]
        # One MXU matmul per step against the resident W_hh.
        gh = jnp.dot(h, w_hh, preferred_element_type=jnp.float32) + b_hhn
        # r and z: a single sigmoid over the combined, vreg-aligned 2*Hp slab.
        rz = jax.nn.sigmoid(gx[:, :2 * Hp] + gh[:, :2 * Hp])
        r = rz[:, :Hp]      # lane offset 0
        z = rz[:, Hp:]      # lane offset 128 -> vreg boundary (no rotate)
        # n gate: b_hh_n stays inside the r*(...) term (torch.nn.GRU semantics)
        n = jnp.tanh(gx[:, 2 * Hp:] + r * gh[:, 2 * Hp:])
        h = (1.0 - z) * n + z * h

    # Final Linear. For O == 1 a VPU multiply + lane reduce avoids a tail
    # N=1 MXU push/pop on the critical epilogue; the bias is an SMEM scalar.
    if O == 1:
        out = jnp.sum(h * w_fc_ref[...], axis=-1, keepdims=True) + b_fc_ref[0]
    else:
        out = jax.lax.dot_general(h, w_fc_ref[...],
                                  (((1,), (1,)), ((), ())),
                                  preferred_element_type=jnp.float32)
        out = out + b_fc_ref[...]
    out_ref[...] = out


def prepare_params(params, hp=_HP):
    """One-time parameter padding / bias fusion (do NOT redo per forward)."""
    w_ih, w_hh = params["w_ih"], params["w_hh"]      # [I,3H], [H,3H]
    b_ih, b_hh = params["b_ih"], params["b_hh"]      # [1,3H], [1,3H]
    w_fc, b_fc = params["w_fc"], params["b_fc"]      # [H,O],  [1,O]
    H = w_hh.shape[0]
    O = w_fc.shape[1]
    assert H <= hp

    def pad_gate_cols(a):
        """[..., 3H] -> [..., 3*Hp] with each gate block zero-padded to Hp."""
        blocks = []
        for g in range(3):
            blk = a[..., g * H:(g + 1) * H]
            blocks.append(jnp.pad(blk, [(0, 0)] * (a.ndim - 1) + [(0, hp - H)]))
        return jnp.concatenate(blocks, axis=-1)

    # b_ih + b_hh folded for r,z; b_ih only for n (b_hh_n stays inside r*()).
    b_g = jnp.concatenate(
        [b_ih[:, :2 * H] + b_hh[:, :2 * H], b_ih[:, 2 * H:]], axis=-1)
    b_hhn = jnp.concatenate(
        [jnp.zeros((1, 2 * H), b_hh.dtype), b_hh[:, 2 * H:]], axis=-1)

    return dict(
        w_ih=pad_gate_cols(w_ih),                                  # [I, 3*Hp]
        b_g=pad_gate_cols(b_g),                                    # [1, 3*Hp]
        w_hh=jnp.pad(pad_gate_cols(w_hh), [(0, hp - H), (0, 0)]),  # [Hp, 3*Hp]
        b_hhn=pad_gate_cols(b_hhn),                                # [1, 3*Hp]
        w_fc=jnp.pad(w_fc.T, [(0, 0), (0, hp - H)]),               # [O, Hp]
        b_fc=(b_fc.reshape(O) if O == 1 else b_fc),                # [O] / [1,O]
    )


def gru_model_forward(x, prep, *, batch_tile=None):
    """x: [B, T, I] f32 -> [B, O] f32 (same math as GRUModel.forward).

    `prep` must come from prepare_params(); the forward is a single
    pallas_call with no XLA ops on the activation path.
    """
    B, T, I = x.shape
    O = prep["w_fc"].shape[0]

    # Batch tiling: one grid step per batch tile, marked "parallel" so v7x's
    # two TensorCores split a large batch; the serial recurrence stays inside
    # one grid step. At B=2 this is a single grid point (no overhead).
    if batch_tile is None:
        batch_tile = B if B <= 128 else 128
    Bt = batch_tile
    assert B % Bt == 0  # TODO(synk): pad ragged batches to a tile multiple
    grid = (B // Bt,)

    vmem = pltpu.MemorySpace.VMEM
    smem = pltpu.MemorySpace.SMEM

    def resident(arr):
        shape = arr.shape
        return pl.BlockSpec(shape, lambda b: (0,) * len(shape),
                            memory_space=vmem)

    b_fc_spec = (pl.BlockSpec((1,), lambda b: (0,), memory_space=smem)
                 if O == 1 else resident(prep["b_fc"]))

    return pl.pallas_call(
        gru_fc_kernel,
        out_shape=jax.ShapeDtypeStruct((B, O), jnp.float32),
        grid=grid,
        in_specs=[
            pl.BlockSpec((Bt, T, I), lambda b: (b, 0, 0), memory_space=vmem),
            resident(prep["w_ih"]),
            resident(prep["b_g"]),
            resident(prep["w_hh"]),
            resident(prep["b_hhn"]),
            resident(prep["w_fc"]),
            b_fc_spec,
        ],
        out_specs=pl.BlockSpec((Bt, O), lambda b: (b, 0), memory_space=vmem),
        compiler_params=pltpu.CompilerParams(
            dimension_semantics=("parallel",)),
    )(x, prep["w_ih"], prep["b_g"], prep["w_hh"], prep["b_hhn"],
      prep["w_fc"], prep["b_fc"])


def init_params(key, input_size=2, hidden_size=32, output_size=1):
    """Deterministic init mirroring torch.nn.GRU / xavier_uniform_ fc."""
    k_ih, k_hh, k_bih, k_bhh, k_fc = jax.random.split(key, 5)
    bound = 1.0 / math.sqrt(hidden_size)
    H, I, O = hidden_size, input_size, output_size

    # torch stores (3H, I) / (3H, H); we keep them transposed for x @ W.
    w_ih = jax.random.uniform(k_ih, (I, 3 * H), jnp.float32, -bound, bound)
    w_hh = jax.random.uniform(k_hh, (H, 3 * H), jnp.float32, -bound, bound)
    b_ih = jax.random.uniform(k_bih, (1, 3 * H), jnp.float32, -bound, bound)
    b_hh = jax.random.uniform(k_bhh, (1, 3 * H), jnp.float32, -bound, bound)

    xav = math.sqrt(6.0 / (H + O))
    w_fc = jax.random.uniform(k_fc, (H, O), jnp.float32, -xav, xav)
    b_fc = jnp.full((1, O), 0.1, jnp.float32)

    return dict(w_ih=w_ih, w_hh=w_hh, b_ih=b_ih, b_hh=b_hh,
                w_fc=w_fc, b_fc=b_fc)


def gru_model_reference(x, params):
    """Pure-JAX reference (same math as torch.nn.GRU, batch_first)."""
    B, T, I = x.shape
    H = params["w_hh"].shape[0]
    h = jnp.zeros((B, H), jnp.float32)
    for t in range(T):
        gx = x[:, t, :] @ params["w_ih"] + params["b_ih"]
        gh = h @ params["w_hh"] + params["b_hh"]
        r = jax.nn.sigmoid(gx[:, :H] + gh[:, :H])
        z = jax.nn.sigmoid(gx[:, H:2 * H] + gh[:, H:2 * H])
        n = jnp.tanh(gx[:, 2 * H:] + r * gh[:, 2 * H:])
        h = (1.0 - z) * n + z * h
    return h @ params["w_fc"] + params["b_fc"]


if __name__ == "__main__":
    B, T, I, H, O = 2, 8, 2, 32, 1
    key = jax.random.PRNGKey(0)
    k_x, k_p = jax.random.split(key)

    x = jax.random.normal(k_x, (B, T, I), dtype=jnp.float32)
    params = init_params(k_p, input_size=I, hidden_size=H, output_size=O)
    prep = prepare_params(params)           # padding / bias fusion done once

    out = gru_model_forward(x, prep)
    out = jax.block_until_ready(out)

    ref = gru_model_reference(x, params)
    assert out.shape == (B, O), out.shape
    assert jnp.allclose(out, ref, atol=1e-5, rtol=1e-5), (out, ref)

    print("KERNEL_OK")
</pallas_src>

<mosaic_0001>
module attributes {stable_mosaic.version = 11 : i64} {
  func.func @gru_fc_kernel(%arg0: i32, %arg1: memref<2x8x2xf32, #tpu.memory_space<vmem>>, %arg2: memref<2x384xf32, #tpu.memory_space<vmem>>, %arg3: memref<1x384xf32, #tpu.memory_space<vmem>>, %arg4: memref<128x384xf32, #tpu.memory_space<vmem>>, %arg5: memref<1x384xf32, #tpu.memory_space<vmem>>, %arg6: memref<1x128xf32, #tpu.memory_space<vmem>>, %arg7: memref<1xf32, #tpu.memory_space<smem>>, %arg8: memref<2x1xf32, #tpu.memory_space<vmem>>) attributes {dimension_semantics = [#tpu.dimension_semantics<parallel>], iteration_bounds = array<i64: 1>, scalar_prefetch = 0 : i64, scratch_operands = 0 : i64, tpu.core_type = #tpu.core_type<tc>, window_params = [{transform_indices = @transform_0, window_bounds = array<i64: 2, 8, 2>}, {pipeline_mode = #tpu.pipeline_mode<synchronous>, transform_indices = @transform_1, window_bounds = array<i64: 2, 384>}, {pipeline_mode = #tpu.pipeline_mode<synchronous>, transform_indices = @transform_2, window_bounds = array<i64: 1, 384>}, {pipeline_mode = #tpu.pipeline_mode<synchronous>, transform_indices = @transform_3, window_bounds = array<i64: 128, 384>}, {pipeline_mode = #tpu.pipeline_mode<synchronous>, transform_indices = @transform_4, window_bounds = array<i64: 1, 384>}, {pipeline_mode = #tpu.pipeline_mode<synchronous>, transform_indices = @transform_5, window_bounds = array<i64: 1, 128>}, {transform_indices = @transform_6, window_bounds = array<i64: 1>}, {transform_indices = @transform_7, window_bounds = array<i64: 2, 1>}]} {
    %c0 = arith.constant 0 : index
    %c0_0 = arith.constant 0 : index
    %0 = vector.load %arg2[%c0, %c0_0] : memref<2x384xf32, #tpu.memory_space<vmem>>, vector<2x384xf32>
    %c0_1 = arith.constant 0 : index
    %c0_2 = arith.constant 0 : index
    %1 = vector.load %arg4[%c0_1, %c0_2] : memref<128x384xf32, #tpu.memory_space<vmem>>, vector<128x384xf32>
    %c0_3 = arith.constant 0 : index
    %c0_4 = arith.constant 0 : index
    %2 = vector.load %arg5[%c0_3, %c0_4] : memref<1x384xf32, #tpu.memory_space<vmem>>, vector<1x384xf32>
    %c0_5 = arith.constant 0 : index
    %c0_6 = arith.constant 0 : index
    %3 = vector.load %arg3[%c0_5, %c0_6] : memref<1x384xf32, #tpu.memory_space<vmem>>, vector<1x384xf32>
    %4 = vector.shape_cast %3 : vector<1x384xf32> to vector<1x384xf32>
    %5 = vector.broadcast %4 : vector<1x384xf32> to vector<2x384xf32>
    %cst = arith.constant 0.000000e+00 : f32
    %6 = vector.broadcast %cst : f32 to vector<2x128xf32>
    %c0_7 = arith.constant 0 : index
    %c0_8 = arith.constant 0 : index
    %c0_9 = arith.constant 0 : index
    %7 = vector.load %arg1[%c0_7, %c0_8, %c0_9] : memref<2x8x2xf32, #tpu.memory_space<vmem>>, vector<2x1x2xf32>
    %8 = vector.shape_cast %7 : vector<2x1x2xf32> to vector<2x2xf32>
    %9 = vector.extract_strided_slice %8 {offsets = [0, 0], sizes = [2, 1], strides = [1, 1]} : vector<2x2xf32> to vector<2x1xf32>
    %10 = vector.extract_strided_slice %0 {offsets = [0, 0], sizes = [1, 384], strides = [1, 1]} : vector<2x384xf32> to vector<1x384xf32>
    %11 = vector.broadcast %9 : vector<2x1xf32> to vector<2x384xf32>
    %12 = vector.broadcast %10 : vector<1x384xf32> to vector<2x384xf32>
    %13 = arith.mulf %11, %12 : vector<2x384xf32>
    %14 = arith.addf %5, %13 : vector<2x384xf32>
    %15 = vector.extract_strided_slice %8 {offsets = [0, 1], sizes = [2, 1], strides = [1, 1]} : vector<2x2xf32> to vector<2x1xf32>
    %16 = vector.extract_strided_slice %0 {offsets = [1, 0], sizes = [1, 384], strides = [1, 1]} : vector<2x384xf32> to vector<1x384xf32>
    %17 = vector.broadcast %15 : vector<2x1xf32> to vector<2x384xf32>
    %18 = vector.broadcast %16 : vector<1x384xf32> to vector<2x384xf32>
    %19 = arith.mulf %17, %18 : vector<2x384xf32>
    %20 = arith.addf %14, %19 : vector<2x384xf32>
    %cst_10 = arith.constant dense<0.000000e+00> : vector<2x384xf32>
    %21 = tpu.matmul %6, %1, %cst_10 {dimension_numbers = #tpu.dot_dimension_numbers<[1], [0], [0], [1], [0, 0, 1, 1], [], []>} : vector<2x128xf32>, vector<128x384xf32>, vector<2x384xf32> -> vector<2x384xf32>
    %22 = vector.broadcast %2 : vector<1x384xf32> to vector<2x384xf32>
    %23 = arith.addf %21, %22 : vector<2x384xf32>
    %24 = vector.extract_strided_slice %20 {offsets = [0, 0], sizes = [2, 256], strides = [1, 1]} : vector<2x384xf32> to vector<2x256xf32>
    %25 = vector.extract_strided_slice %23 {offsets = [0, 0], sizes = [2, 256], strides = [1, 1]} : vector<2x384xf32> to vector<2x256xf32>
    %26 = arith.addf %24, %25 : vector<2x256xf32>
    %27 = arith.negf %26 : vector<2x256xf32>
    %28 = math.exp %27 : vector<2x256xf32>
    %cst_11 = arith.constant 1.000000e+00 : f32
    %29 = vector.broadcast %cst_11 : f32 to vector<2x256xf32>
    %30 = arith.addf %29, %28 : vector<2x256xf32>
    %31 = arith.divf %29, %30 : vector<2x256xf32>
    %32 = vector.extract_strided_slice %31 {offsets = [0, 0], sizes = [2, 128], strides = [1, 1]} : vector<2x256xf32> to vector<2x128xf32>
    %33 = vector.extract_strided_slice %31 {offsets = [0, 128], sizes = [2, 128], strides = [1, 1]} : vector<2x256xf32> to vector<2x128xf32>
    %34 = vector.extract_strided_slice %20 {offsets = [0, 256], sizes = [2, 128], strides = [1, 1]} : vector<2x384xf32> to vector<2x128xf32>
    %35 = vector.extract_strided_slice %23 {offsets = [0, 256], sizes = [2, 128], strides = [1, 1]} : vector<2x384xf32> to vector<2x128xf32>
    %36 = arith.mulf %32, %35 : vector<2x128xf32>
    %37 = arith.addf %34, %36 : vector<2x128xf32>
    %38 = math.tanh %37 : vector<2x128xf32>
    %cst_12 = arith.constant 1.000000e+00 : f32
    %39 = vector.broadcast %cst_12 : f32 to vector<2x128xf32>
    %40 = arith.subf %39, %33 : vector<2x128xf32>
    %41 = arith.mulf %40, %38 : vector<2x128xf32>
    %42 = arith.mulf %33, %6 : vector<2x128xf32>
    %43 = arith.addf %41, %42 : vector<2x128xf32>
    %c0_13 = arith.constant 0 : index
    %c1 = arith.constant 1 : index
    %c0_14 = arith.constant 0 : index
    %44 = vector.load %arg1[%c0_13, %c1, %c0_14] : memref<2x8x2xf32, #tpu.memory_space<vmem>>, vector<2x1x2xf32>
    %45 = vector.shape_cast %44 : vector<2x1x2xf32> to vector<2x2xf32>
    %46 = vector.extract_strided_slice %45 {offsets = [0, 0], sizes = [2, 1], strides = [1, 1]} : vector<2x2xf32> to vector<2x1xf32>
    %47 = vector.extract_strided_slice %0 {offsets = [0, 0], sizes = [1, 384], strides = [1, 1]} : vector<2x384xf32> to vector<1x384xf32>
    %48 = vector.broadcast %46 : vector<2x1xf32> to vector<2x384xf32>
    %49 = vector.broadcast %47 : vector<1x384xf32> to vector<2x384xf32>
    %50 = arith.mulf %48, %49 : vector<2x384xf32>
    %51 = arith.addf %5, %50 : vector<2x384xf32>
    %52 = vector.extract_strided_slice %45 {offsets = [0, 1], sizes = [2, 1], strides = [1, 1]} : vector<2x2xf32> to vector<2x1xf32>
    %53 = vector.extract_strided_slice %0 {offsets = [1, 0], sizes = [1, 384], strides = [1, 1]} : vector<2x384xf32> to vector<1x384xf32>
    %54 = vector.broadcast %52 : vector<2x1xf32> to vector<2x384xf32>
    %55 = vector.broadcast %53 : vector<1x384xf32> to vector<2x384xf32>
    %56 = arith.mulf %54, %55 : vector<2x384xf32>
    %57 = arith.addf %51, %56 : vector<2x384xf32>
    %cst_15 = arith.constant dense<0.000000e+00> : vector<2x384xf32>
    %58 = tpu.matmul %43, %1, %cst_15 {dimension_numbers = #tpu.dot_dimension_numbers<[1], [0], [0], [1], [0, 0, 1, 1], [], []>} : vector<2x128xf32>, vector<128x384xf32>, vector<2x384xf32> -> vector<2x384xf32>
    %59 = vector.broadcast %2 : vector<1x384xf32> to vector<2x384xf32>
    %60 = arith.addf %58, %59 : vector<2x384xf32>
    %61 = vector.extract_strided_slice %57 {offsets = [0, 0], sizes = [2, 256], strides = [1, 1]} : vector<2x384xf32> to vector<2x256xf32>
    %62 = vector.extract_strided_slice %60 {offsets = [0, 0], sizes = [2, 256], strides = [1, 1]} : vector<2x384xf32> to vector<2x256xf32>
    %63 = arith.addf %61, %62 : vector<2x256xf32>
    %64 = arith.negf %63 : vector<2x256xf32>
    %65 = math.exp %64 : vector<2x256xf32>
    %cst_16 = arith.constant 1.000000e+00 : f32
    %66 = vector.broadcast %cst_16 : f32 to vector<2x256xf32>
    %67 = arith.addf %66, %65 : vector<2x256xf32>
    %68 = arith.divf %66, %67 : vector<2x256xf32>
    %69 = vector.extract_strided_slice %68 {offsets = [0, 0], sizes = [2, 128], strides = [1, 1]} : vector<2x256xf32> to vector<2x128xf32>
    %70 = vector.extract_strided_slice %68 {offsets = [0, 128], sizes = [2, 128], strides = [1, 1]} : vector<2x256xf32> to vector<2x128xf32>
    %71 = vector.extract_strided_slice %57 {offsets = [0, 256], sizes = [2, 128], strides = [1, 1]} : vector<2x384xf32> to vector<2x128xf32>
    %72 = vector.extract_strided_slice %60 {offsets = [0, 256], sizes = [2, 128], strides = [1, 1]} : vector<2x384xf32> to vector<2x128xf32>
    %73 = arith.mulf %69, %72 : vector<2x128xf32>
    %74 = arith.addf %71, %73 : vector<2x128xf32>
    %75 = math.tanh %74 : vector<2x128xf32>
    %cst_17 = arith.constant 1.000000e+00 : f32
    %76 = vector.broadcast %cst_17 : f32 to vector<2x128xf32>
    %77 = arith.subf %76, %70 : vector<2x128xf32>
    %78 = arith.mulf %77, %75 : vector<2x128xf32>
    %79 = arith.mulf %70, %43 : vector<2x128xf32>
    %80 = arith.addf %78, %79 : vector<2x128xf32>
    %c0_18 = arith.constant 0 : index
    %c2 = arith.constant 2 : index
    %c0_19 = arith.constant 0 : index
    %81 = vector.load %arg1[%c0_18, %c2, %c0_19] : memref<2x8x2xf32, #tpu.memory_space<vmem>>, vector<2x1x2xf32>
    %82 = vector.shape_cast %81 : vector<2x1x2xf32> to vector<2x2xf32>
    %83 = vector.extract_strided_slice %82 {offsets = [0, 0], sizes = [2, 1], strides = [1, 1]} : vector<2x2xf32> to vector<2x1xf32>
    %84 = vector.extract_strided_slice %0 {offsets = [0, 0], sizes = [1, 384], strides = [1, 1]} : vector<2x384xf32> to vector<1x384xf32>
    %85 = vector.broadcast %83 : vector<2x1xf32> to vector<2x384xf32>
    %86 = vector.broadcast %84 : vector<1x384xf32> to vector<2x384xf32>
    %87 = arith.mulf %85, %86 : vector<2x384xf32>
    %88 = arith.addf %5, %87 : vector<2x384xf32>
    %89 = vector.extract_strided_slice %82 {offsets = [0, 1], sizes = [2, 1], strides = [1, 1]} : vector<2x2xf32> to vector<2x1xf32>
    %90 = vector.extract_strided_slice %0 {offsets = [1, 0], sizes = [1, 384], strides = [1, 1]} : vector<2x384xf32> to vector<1x384xf32>
    %91 = vector.broadcast %89 : vector<2x1xf32> to vector<2x384xf32>
    %92 = vector.broadcast %90 : vector<1x384xf32> to vector<2x384xf32>
    %93 = arith.mulf %91, %92 : vector<2x384xf32>
    %94 = arith.addf %88, %93 : vector<2x384xf32>
    %cst_20 = arith.constant dense<0.000000e+00> : vector<2x384xf32>
    %95 = tpu.matmul %80, %1, %cst_20 {dimension_numbers = #tpu.dot_dimension_numbers<[1], [0], [0], [1], [0, 0, 1, 1], [], []>} : vector<2x128xf32>, vector<128x384xf32>, vector<2x384xf32> -> vector<2x384xf32>
    %96 = vector.broadcast %2 : vector<1x384xf32> to vector<2x384xf32>
    %97 = arith.addf %95, %96 : vector<2x384xf32>
    %98 = vector.extract_strided_slice %94 {offsets = [0, 0], sizes = [2, 256], strides = [1, 1]} : vector<2x384xf32> to vector<2x256xf32>
    %99 = vector.extract_strided_slice %97 {offsets = [0, 0], sizes = [2, 256], strides = [1, 1]} : vector<2x384xf32> to vector<2x256xf32>
    %100 = arith.addf %98, %99 : vector<2x256xf32>
    %101 = arith.negf %100 : vector<2x256xf32>
    %102 = math.exp %101 : vector<2x256xf32>
    %cst_21 = arith.constant 1.000000e+00 : f32
    %103 = vector.broadcast %cst_21 : f32 to vector<2x256xf32>
    %104 = arith.addf %103, %102 : vector<2x256xf32>
    %105 = arith.divf %103, %104 : vector<2x256xf32>
    %106 = vector.extract_strided_slice %105 {offsets = [0, 0], sizes = [2, 128], strides = [1, 1]} : vector<2x256xf32> to vector<2x128xf32>
    %107 = vector.extract_strided_slice %105 {offsets = [0, 128], sizes = [2, 128], strides = [1, 1]} : vector<2x256xf32> to vector<2x128xf32>
    %108 = vector.extract_strided_slice %94 {offsets = [0, 256], sizes = [2, 128], strides = [1, 1]} : vector<2x384xf32> to vector<2x128xf32>
    %109 = vector.extract_strided_slice %97 {offsets = [0, 256], sizes = [2, 128], strides = [1, 1]} : vector<2x384xf32> to vector<2x128xf32>
    %110 = arith.mulf %106, %109 : vector<2x128xf32>
    %111 = arith.addf %108, %110 : vector<2x128xf32>
    %112 = math.tanh %111 : vector<2x128xf32>
    %cst_22 = arith.constant 1.000000e+00 : f32
    %113 = vector.broadcast %cst_22 : f32 to vector<2x128xf32>
    %114 = arith.subf %113, %107 : vector<2x128xf32>
    %115 = arith.mulf %114, %112 : vector<2x128xf32>
    %116 = arith.mulf %107, %80 : vector<2x128xf32>
    %117 = arith.addf %115, %116 : vector<2x128xf32>
    %c0_23 = arith.constant 0 : index
    %c3 = arith.constant 3 : index
    %c0_24 = arith.constant 0 : index
    %118 = vector.load %arg1[%c0_23, %c3, %c0_24] : memref<2x8x2xf32, #tpu.memory_space<vmem>>, vector<2x1x2xf32>
    %119 = vector.shape_cast %118 : vector<2x1x2xf32> to vector<2x2xf32>
    %120 = vector.extract_strided_slice %119 {offsets = [0, 0], sizes = [2, 1], strides = [1, 1]} : vector<2x2xf32> to vector<2x1xf32>
    %121 = vector.extract_strided_slice %0 {offsets = [0, 0], sizes = [1, 384], strides = [1, 1]} : vector<2x384xf32> to vector<1x384xf32>
    %122 = vector.broadcast %120 : vector<2x1xf32> to vector<2x384xf32>
    %123 = vector.broadcast %121 : vector<1x384xf32> to vector<2x384xf32>
    %124 = arith.mulf %122, %123 : vector<2x384xf32>
    %125 = arith.addf %5, %124 : vector<2x384xf32>
    %126 = vector.extract_strided_slice %119 {offsets = [0, 1], sizes = [2, 1], strides = [1, 1]} : vector<2x2xf32> to vector<2x1xf32>
    %127 = vector.extract_strided_slice %0 {offsets = [1, 0], sizes = [1, 384], strides = [1, 1]} : vector<2x384xf32> to vector<1x384xf32>
    %128 = vector.broadcast %126 : vector<2x1xf32> to vector<2x384xf32>
    %129 = vector.broadcast %127 : vector<1x384xf32> to vector<2x384xf32>
    %130 = arith.mulf %128, %129 : vector<2x384xf32>
    %131 = arith.addf %125, %130 : vector<2x384xf32>
    %cst_25 = arith.constant dense<0.000000e+00> : vector<2x384xf32>
    %132 = tpu.matmul %117, %1, %cst_25 {dimension_numbers = #tpu.dot_dimension_numbers<[1], [0], [0], [1], [0, 0, 1, 1], [], []>} : vector<2x128xf32>, vector<128x384xf32>, vector<2x384xf32> -> vector<2x384xf32>
    %133 = vector.broadcast %2 : vector<1x384xf32> to vector<2x384xf32>
    %134 = arith.addf %132, %133 : vector<2x384xf32>
    %135 = vector.extract_strided_slice %131 {offsets = [0, 0], sizes = [2, 256], strides = [1, 1]} : vector<2x384xf32> to vector<2x256xf32>
    %136 = vector.extract_strided_slice %134 {offsets = [0, 0], sizes = [2, 256], strides = [1, 1]} : vector<2x384xf32> to vector<2x256xf32>
    %137 = arith.addf %135, %136 : vector<2x256xf32>
    %138 = arith.negf %137 : vector<2x256xf32>
    %139 = math.exp %138 : vector<2x256xf32>
    %cst_26 = arith.constant 1.000000e+00 : f32
    %140 = vector.broadcast %cst_26 : f32 to vector<2x256xf32>
    %141 = arith.addf %140, %139 : vector<2x256xf32>
    %142 = arith.divf %140, %141 : vector<2x256xf32>
    %143 = vector.extract_strided_slice %142 {offsets = [0, 0], sizes = [2, 128], strides = [1, 1]} : vector<2x256xf32> to vector<2x128xf32>
    %144 = vector.extract_strided_slice %142 {offsets = [0, 128], sizes = [2, 128], strides = [1, 1]} : vector<2x256xf32> to vector<2x128xf32>
    %145 = vector.extract_strided_slice %131 {offsets = [0, 256], sizes = [2, 128], strides = [1, 1]} : vector<2x384xf32> to vector<2x128xf32>
    %146 = vector.extract_strided_slice %134 {offsets = [0, 256], sizes = [2, 128], strides = [1, 1]} : vector<2x384xf32> to vector<2x128xf32>
    %147 = arith.mulf %143, %146 : vector<2x128xf32>
    %148 = arith.addf %145, %147 : vector<2x128xf32>
    %149 = math.tanh %148 : vector<2x128xf32>
    %cst_27 = arith.constant 1.000000e+00 : f32
    %150 = vector.broadcast %cst_27 : f32 to vector<2x128xf32>
    %151 = arith.subf %150, %144 : vector<2x128xf32>
    %152 = arith.mulf %151, %149 : vector<2x128xf32>
    %153 = arith.mulf %144, %117 : vector<2x128xf32>
    %154 = arith.addf %152, %153 : vector<2x128xf32>
    %c0_28 = arith.constant 0 : index
    %c4 = arith.constant 4 : index
    %c0_29 = arith.constant 0 : index
    %155 = vector.load %arg1[%c0_28, %c4, %c0_29] : memref<2x8x2xf32, #tpu.memory_space<vmem>>, vector<2x1x2xf32>
    %156 = vector.shape_cast %155 : vector<2x1x2xf32> to vector<2x2xf32>
    %157 = vector.extract_strided_slice %156 {offsets = [0, 0], sizes = [2, 1], strides = [1, 1]} : vector<2x2xf32> to vector<2x1xf32>
    %158 = vector.extract_strided_slice %0 {offsets = [0, 0], sizes = [1, 384], strides = [1, 1]} : vector<2x384xf32> to vector<1x384xf32>
    %159 = vector.broadcast %157 : vector<2x1xf32> to vector<2x384xf32>
    %160 = vector.broadcast %158 : vector<1x384xf32> to vector<2x384xf32>
    %161 = arith.mulf %159, %160 : vector<2x384xf32>
    %162 = arith.addf %5, %161 : vector<2x384xf32>
    %163 = vector.extract_strided_slice %156 {offsets = [0, 1], sizes = [2, 1], strides = [1, 1]} : vector<2x2xf32> to vector<2x1xf32>
    %164 = vector.extract_strided_slice %0 {offsets = [1, 0], sizes = [1, 384], strides = [1, 1]} : vector<2x384xf32> to vector<1x384xf32>
    %165 = vector.broadcast %163 : vector<2x1xf32> to vector<2x384xf32>
    %166 = vector.broadcast %164 : vector<1x384xf32> to vector<2x384xf32>
    %167 = arith.mulf %165, %166 : vector<2x384xf32>
    %168 = arith.addf %162, %167 : vector<2x384xf32>
    %cst_30 = arith.constant dense<0.000000e+00> : vector<2x384xf32>
    %169 = tpu.matmul %154, %1, %cst_30 {dimension_numbers = #tpu.dot_dimension_numbers<[1], [0], [0], [1], [0, 0, 1, 1], [], []>} : vector<2x128xf32>, vector<128x384xf32>, vector<2x384xf32> -> vector<2x384xf32>
    %170 = vector.broadcast %2 : vector<1x384xf32> to vector<2x384xf32>
    %171 = arith.addf %169, %170 : vector<2x384xf32>
    %172 = vector.extract_strided_slice %168 {offsets = [0, 0], sizes = [2, 256], strides = [1, 1]} : vector<2x384xf32> to vector<2x256xf32>
    %173 = vector.extract_strided_slice %171 {offsets = [0, 0], sizes = [2, 256], strides = [1, 1]} : vector<2x384xf32> to vector<2x256xf32>
    %174 = arith.addf %172, %173 : vector<2x256xf32>
    %175 = arith.negf %174 : vector<2x256xf32>
    %176 = math.exp %175 : vector<2x256xf32>
    %cst_31 = arith.constant 1.000000e+00 : f32
    %177 = vector.broadcast %cst_31 : f32 to vector<2x256xf32>
    %178 = arith.addf %177, %176 : vector<2x256xf32>
    %179 = arith.divf %177, %178 : vector<2x256xf32>
    %180 = vector.extract_strided_slice %179 {offsets = [0, 0], sizes = [2, 128], strides = [1, 1]} : vector<2x256xf32> to vector<2x128xf32>
    %181 = vector.extract_strided_slice %179 {offsets = [0, 128], sizes = [2, 128], strides = [1, 1]} : vector<2x256xf32> to vector<2x128xf32>
    %182 = vector.extract_strided_slice %168 {offsets = [0, 256], sizes = [2, 128], strides = [1, 1]} : vector<2x384xf32> to vector<2x128xf32>
    %183 = vector.extract_strided_slice %171 {offsets = [0, 256], sizes = [2, 128], strides = [1, 1]} : vector<2x384xf32> to vector<2x128xf32>
    %184 = arith.mulf %180, %183 : vector<2x128xf32>
    %185 = arith.addf %182, %184 : vector<2x128xf32>
    %186 = math.tanh %185 : vector<2x128xf32>
    %cst_32 = arith.constant 1.000000e+00 : f32
    %187 = vector.broadcast %cst_32 : f32 to vector<2x128xf32>
    %188 = arith.subf %187, %181 : vector<2x128xf32>
    %189 = arith.mulf %188, %186 : vector<2x128xf32>
    %190 = arith.mulf %181, %154 : vector<2x128xf32>
    %191 = arith.addf %189, %190 : vector<2x128xf32>
    %c0_33 = arith.constant 0 : index
    %c5 = arith.constant 5 : index
    %c0_34 = arith.constant 0 : index
    %192 = vector.load %arg1[%c0_33, %c5, %c0_34] : memref<2x8x2xf32, #tpu.memory_space<vmem>>, vector<2x1x2xf32>
    %193 = vector.shape_cast %192 : vector<2x1x2xf32> to vector<2x2xf32>
    %194 = vector.extract_strided_slice %193 {offsets = [0, 0], sizes = [2, 1], strides = [1, 1]} : vector<2x2xf32> to vector<2x1xf32>
    %195 = vector.extract_strided_slice %0 {offsets = [0, 0], sizes = [1, 384], strides = [1, 1]} : vector<2x384xf32> to vector<1x384xf32>
    %196 = vector.broadcast %194 : vector<2x1xf32> to vector<2x384xf32>
    %197 = vector.broadcast %195 : vector<1x384xf32> to vector<2x384xf32>
    %198 = arith.mulf %196, %197 : vector<2x384xf32>
    %199 = arith.addf %5, %198 : vector<2x384xf32>
    %200 = vector.extract_strided_slice %193 {offsets = [0, 1], sizes = [2, 1], strides = [1, 1]} : vector<2x2xf32> to vector<2x1xf32>
    %201 = vector.extract_strided_slice %0 {offsets = [1, 0], sizes = [1, 384], strides = [1, 1]} : vector<2x384xf32> to vector<1x384xf32>
    %202 = vector.broadcast %200 : vector<2x1xf32> to vector<2x384xf32>
    %203 = vector.broadcast %201 : vector<1x384xf32> to vector<2x384xf32>
    %204 = arith.mulf %202, %203 : vector<2x384xf32>
    %205 = arith.addf %199, %204 : vector<2x384xf32>
    %cst_35 = arith.constant dense<0.000000e+00> : vector<2x384xf32>
    %206 = tpu.matmul %191, %1, %cst_35 {dimension_numbers = #tpu.dot_dimension_numbers<[1], [0], [0], [1], [0, 0, 1, 1], [], []>} : vector<2x128xf32>, vector<128x384xf32>, vector<2x384xf32> -> vector<2x384xf32>
    %207 = vector.broadcast %2 : vector<1x384xf32> to vector<2x384xf32>
    %208 = arith.addf %206, %207 : vector<2x384xf32>
    %209 = vector.extract_strided_slice %205 {offsets = [0, 0], sizes = [2, 256], strides = [1, 1]} : vector<2x384xf32> to vector<2x256xf32>
    %210 = vector.extract_strided_slice %208 {offsets = [0, 0], sizes = [2, 256], strides = [1, 1]} : vector<2x384xf32> to vector<2x256xf32>
    %211 = arith.addf %209, %210 : vector<2x256xf32>
    %212 = arith.negf %211 : vector<2x256xf32>
    %213 = math.exp %212 : vector<2x256xf32>
    %cst_36 = arith.constant 1.000000e+00 : f32
    %214 = vector.broadcast %cst_36 : f32 to vector<2x256xf32>
    %215 = arith.addf %214, %213 : vector<2x256xf32>
    %216 = arith.divf %214, %215 : vector<2x256xf32>
    %217 = vector.extract_strided_slice %216 {offsets = [0, 0], sizes = [2, 128], strides = [1, 1]} : vector<2x256xf32> to vector<2x128xf32>
    %218 = vector.extract_strided_slice %216 {offsets = [0, 128], sizes = [2, 128], strides = [1, 1]} : vector<2x256xf32> to vector<2x128xf32>
    %219 = vector.extract_strided_slice %205 {offsets = [0, 256], sizes = [2, 128], strides = [1, 1]} : vector<2x384xf32> to vector<2x128xf32>
    %220 = vector.extract_strided_slice %208 {offsets = [0, 256], sizes = [2, 128], strides = [1, 1]} : vector<2x384xf32> to vector<2x128xf32>
    %221 = arith.mulf %217, %220 : vector<2x128xf32>
    %222 = arith.addf %219, %221 : vector<2x128xf32>
    %223 = math.tanh %222 : vector<2x128xf32>
    %cst_37 = arith.constant 1.000000e+00 : f32
    %224 = vector.broadcast %cst_37 : f32 to vector<2x128xf32>
    %225 = arith.subf %224, %218 : vector<2x128xf32>
    %226 = arith.mulf %225, %223 : vector<2x128xf32>
    %227 = arith.mulf %218, %191 : vector<2x128xf32>
    %228 = arith.addf %226, %227 : vector<2x128xf32>
    %c0_38 = arith.constant 0 : index
    %c6 = arith.constant 6 : index
    %c0_39 = arith.constant 0 : index
    %229 = vector.load %arg1[%c0_38, %c6, %c0_39] : memref<2x8x2xf32, #tpu.memory_space<vmem>>, vector<2x1x2xf32>
    %230 = vector.shape_cast %229 : vector<2x1x2xf32> to vector<2x2xf32>
    %231 = vector.extract_strided_slice %230 {offsets = [0, 0], sizes = [2, 1], strides = [1, 1]} : vector<2x2xf32> to vector<2x1xf32>
    %232 = vector.extract_strided_slice %0 {offsets = [0, 0], sizes = [1, 384], strides = [1, 1]} : vector<2x384xf32> to vector<1x384xf32>
    %233 = vector.broadcast %231 : vector<2x1xf32> to vector<2x384xf32>
    %234 = vector.broadcast %232 : vector<1x384xf32> to vector<2x384xf32>
    %235 = arith.mulf %233, %234 : vector<2x384xf32>
    %236 = arith.addf %5, %235 : vector<2x384xf32>
    %237 = vector.extract_strided_slice %230 {offsets = [0, 1], sizes = [2, 1], strides = [1, 1]} : vector<2x2xf32> to vector<2x1xf32>
    %238 = vector.extract_strided_slice %0 {offsets = [1, 0], sizes = [1, 384], strides = [1, 1]} : vector<2x384xf32> to vector<1x384xf32>
    %239 = vector.broadcast %237 : vector<2x1xf32> to vector<2x384xf32>
    %240 = vector.broadcast %238 : vector<1x384xf32> to vector<2x384xf32>
    %241 = arith.mulf %239, %240 : vector<2x384xf32>
    %242 = arith.addf %236, %241 : vector<2x384xf32>
    %cst_40 = arith.constant dense<0.000000e+00> : vector<2x384xf32>
    %243 = tpu.matmul %228, %1, %cst_40 {dimension_numbers = #tpu.dot_dimension_numbers<[1], [0], [0], [1], [0, 0, 1, 1], [], []>} : vector<2x128xf32>, vector<128x384xf32>, vector<2x384xf32> -> vector<2x384xf32>
    %244 = vector.broadcast %2 : vector<1x384xf32> to vector<2x384xf32>
    %245 = arith.addf %243, %244 : vector<2x384xf32>
    %246 = vector.extract_strided_slice %242 {offsets = [0, 0], sizes = [2, 256], strides = [1, 1]} : vector<2x384xf32> to vector<2x256xf32>
    %247 = vector.extract_strided_slice %245 {offsets = [0, 0], sizes = [2, 256], strides = [1, 1]} : vector<2x384xf32> to vector<2x256xf32>
    %248 = arith.addf %246, %247 : vector<2x256xf32>
    %249 = arith.negf %248 : vector<2x256xf32>
    %250 = math.exp %249 : vector<2x256xf32>
    %cst_41 = arith.constant 1.000000e+00 : f32
    %251 = vector.broadcast %cst_41 : f32 to vector<2x256xf32>
    %252 = arith.addf %251, %250 : vector<2x256xf32>
    %253 = arith.divf %251, %252 : vector<2x256xf32>
    %254 = vector.extract_strided_slice %253 {offsets = [0, 0], sizes = [2, 128], strides = [1, 1]} : vector<2x256xf32> to vector<2x128xf32>
    %255 = vector.extract_strided_slice %253 {offsets = [0, 128], sizes = [2, 128], strides = [1, 1]} : vector<2x256xf32> to vector<2x128xf32>
    %256 = vector.extract_strided_slice %242 {offsets = [0, 256], sizes = [2, 128], strides = [1, 1]} : vector<2x384xf32> to vector<2x128xf32>
    %257 = vector.extract_strided_slice %245 {offsets = [0, 256], sizes = [2, 128], strides = [1, 1]} : vector<2x384xf32> to vector<2x128xf32>
    %258 = arith.mulf %254, %257 : vector<2x128xf32>
    %259 = arith.addf %256, %258 : vector<2x128xf32>
    %260 = math.tanh %259 : vector<2x128xf32>
    %cst_42 = arith.constant 1.000000e+00 : f32
    %261 = vector.broadcast %cst_42 : f32 to vector<2x128xf32>
    %262 = arith.subf %261, %255 : vector<2x128xf32>
    %263 = arith.mulf %262, %260 : vector<2x128xf32>
    %264 = arith.mulf %255, %228 : vector<2x128xf32>
    %265 = arith.addf %263, %264 : vector<2x128xf32>
    %c0_43 = arith.constant 0 : index
    %c7 = arith.constant 7 : index
    %c0_44 = arith.constant 0 : index
    %266 = vector.load %arg1[%c0_43, %c7, %c0_44] : memref<2x8x2xf32, #tpu.memory_space<vmem>>, vector<2x1x2xf32>
    %267 = vector.shape_cast %266 : vector<2x1x2xf32> to vector<2x2xf32>
    %268 = vector.extract_strided_slice %267 {offsets = [0, 0], sizes = [2, 1], strides = [1, 1]} : vector<2x2xf32> to vector<2x1xf32>
    %269 = vector.extract_strided_slice %0 {offsets = [0, 0], sizes = [1, 384], strides = [1, 1]} : vector<2x384xf32> to vector<1x384xf32>
    %270 = vector.broadcast %268 : vector<2x1xf32> to vector<2x384xf32>
    %271 = vector.broadcast %269 : vector<1x384xf32> to vector<2x384xf32>
    %272 = arith.mulf %270, %271 : vector<2x384xf32>
    %273 = arith.addf %5, %272 : vector<2x384xf32>
    %274 = vector.extract_strided_slice %267 {offsets = [0, 1], sizes = [2, 1], strides = [1, 1]} : vector<2x2xf32> to vector<2x1xf32>
    %275 = vector.extract_strided_slice %0 {offsets = [1, 0], sizes = [1, 384], strides = [1, 1]} : vector<2x384xf32> to vector<1x384xf32>
    %276 = vector.broadcast %274 : vector<2x1xf32> to vector<2x384xf32>
    %277 = vector.broadcast %275 : vector<1x384xf32> to vector<2x384xf32>
    %278 = arith.mulf %276, %277 : vector<2x384xf32>
    %279 = arith.addf %273, %278 : vector<2x384xf32>
    %cst_45 = arith.constant dense<0.000000e+00> : vector<2x384xf32>
    %280 = tpu.matmul %265, %1, %cst_45 {dimension_numbers = #tpu.dot_dimension_numbers<[1], [0], [0], [1], [0, 0, 1, 1], [], []>} : vector<2x128xf32>, vector<128x384xf32>, vector<2x384xf32> -> vector<2x384xf32>
    %281 = vector.broadcast %2 : vector<1x384xf32> to vector<2x384xf32>
    %282 = arith.addf %280, %281 : vector<2x384xf32>
    %283 = vector.extract_strided_slice %279 {offsets = [0, 0], sizes = [2, 256], strides = [1, 1]} : vector<2x384xf32> to vector<2x256xf32>
    %284 = vector.extract_strided_slice %282 {offsets = [0, 0], sizes = [2, 256], strides = [1, 1]} : vector<2x384xf32> to vector<2x256xf32>
    %285 = arith.addf %283, %284 : vector<2x256xf32>
    %286 = arith.negf %285 : vector<2x256xf32>
    %287 = math.exp %286 : vector<2x256xf32>
    %cst_46 = arith.constant 1.000000e+00 : f32
    %288 = vector.broadcast %cst_46 : f32 to vector<2x256xf32>
    %289 = arith.addf %288, %287 : vector<2x256xf32>
    %290 = arith.divf %288, %289 : vector<2x256xf32>
    %291 = vector.extract_strided_slice %290 {offsets = [0, 0], sizes = [2, 128], strides = [1, 1]} : vector<2x256xf32> to vector<2x128xf32>
    %292 = vector.extract_strided_slice %290 {offsets = [0, 128], sizes = [2, 128], strides = [1, 1]} : vector<2x256xf32> to vector<2x128xf32>
    %293 = vector.extract_strided_slice %279 {offsets = [0, 256], sizes = [2, 128], strides = [1, 1]} : vector<2x384xf32> to vector<2x128xf32>
    %294 = vector.extract_strided_slice %282 {offsets = [0, 256], sizes = [2, 128], strides = [1, 1]} : vector<2x384xf32> to vector<2x128xf32>
    %295 = arith.mulf %291, %294 : vector<2x128xf32>
    %296 = arith.addf %293, %295 : vector<2x128xf32>
    %297 = math.tanh %296 : vector<2x128xf32>
    %cst_47 = arith.constant 1.000000e+00 : f32
    %298 = vector.broadcast %cst_47 : f32 to vector<2x128xf32>
    %299 = arith.subf %298, %292 : vector<2x128xf32>
    %300 = arith.mulf %299, %297 : vector<2x128xf32>
    %301 = arith.mulf %292, %265 : vector<2x128xf32>
    %302 = arith.addf %300, %301 : vector<2x128xf32>
    %c0_48 = arith.constant 0 : index
    %c0_49 = arith.constant 0 : index
    %303 = vector.load %arg6[%c0_48, %c0_49] : memref<1x128xf32, #tpu.memory_space<vmem>>, vector<1x128xf32>
    %304 = vector.broadcast %303 : vector<1x128xf32> to vector<2x128xf32>
    %305 = arith.mulf %302, %304 : vector<2x128xf32>
    %cst_50 = arith.constant dense<0.000000e+00> : vector<2xf32>
    %306 = vector.multi_reduction <add>, %305, %cst_50 [1] : vector<2x128xf32> to vector<2xf32>
    %307 = vector.shape_cast %306 : vector<2xf32> to vector<2x1xf32>
    %c0_51 = arith.constant 0 : index
    %308 = memref.load %arg7[%c0_51] : memref<1xf32, #tpu.memory_space<smem>>
    %309 = vector.broadcast %308 : f32 to vector<2x1xf32>
    %310 = arith.addf %307, %309 : vector<2x1xf32>
    %c0_52 = arith.constant 0 : index
    %c0_53 = arith.constant 0 : index
    %311 = vector.load %arg8[%c0_52, %c0_53] : memref<2x1xf32, #tpu.memory_space<vmem>>, vector<2x1xf32>
    tpu.vector_store %arg8[%c0_52, %c0_53], %310 {strides = array<i32>} : memref<2x1xf32, #tpu.memory_space<vmem>>, vector<2x1xf32>,
    return
  }
  func.func @transform_0(%arg0: i32) -> (i32, i32, i32) {
    %c0_i32 = arith.constant 0 : i32
    %c0_i32_0 = arith.constant 0 : i32
    %c0_i32_1 = arith.constant 0 : i32
    return %arg0, %c0_i32, %c0_i32_0 : i32, i32, i32
  }
  func.func @transform_1(%arg0: i32) -> (i32, i32) {
    %c0_i32 = arith.constant 0 : i32
    %c0_i32_0 = arith.constant 0 : i32
    %c0_i32_1 = arith.constant 0 : i32
    return %c0_i32, %c0_i32_0 : i32, i32
  }
  func.func @transform_2(%arg0: i32) -> (i32, i32) {
    %c0_i32 = arith.constant 0 : i32
    %c0_i32_0 = arith.constant 0 : i32
    %c0_i32_1 = arith.constant 0 : i32
    return %c0_i32, %c0_i32_0 : i32, i32
  }
  func.func @transform_3(%arg0: i32) -> (i32, i32) {
    %c0_i32 = arith.constant 0 : i32
    %c0_i32_0 = arith.constant 0 : i32
    %c0_i32_1 = arith.constant 0 : i32
    return %c0_i32, %c0_i32_0 : i32, i32
  }
  func.func @transform_4(%arg0: i32) -> (i32, i32) {
    %c0_i32 = arith.constant 0 : i32
    %c0_i32_0 = arith.constant 0 : i32
    %c0_i32_1 = arith.constant 0 : i32
    return %c0_i32, %c0_i32_0 : i32, i32
  }
  func.func @transform_5(%arg0: i32) -> (i32, i32) {
    %c0_i32 = arith.constant 0 : i32
    %c0_i32_0 = arith.constant 0 : i32
    %c0_i32_1 = arith.constant 0 : i32
    return %c0_i32, %c0_i32_0 : i32, i32
  }
  func.func @transform_6(%arg0: i32) -> i32 {
    %c0_i32 = arith.constant 0 : i32
    %c0_i32_0 = arith.constant 0 : i32
    return %c0_i32 : i32
  }
  func.func @transform_7(%arg0: i32) -> (i32, i32) {
    %c0_i32 = arith.constant 0 : i32
    %c0_i32_0 = arith.constant 0 : i32
    return %arg0, %c0_i32 : i32, i32
  }
}

</mosaic_0001>

<bundles_post_ra>
// kernel: tpu_custom_call.1
= control target key start
LH: loop header
LB: loop body
LE: loop exit
PB: predicated region body
PF: predicated region fallthrough
CT: control target
= control target key end

     0   :  { %13 = vsyncpa [#allocation4], 0  ;;  %s3058_s24 = smov [#allocation3]   ;;  %s3793_s0 = inlined_call_operand.vmem [shape: f32[2,8,2], index: 0, kind: input, shape index: {}]   ;;  %s3794_s1 = inlined_call_operand.vmem [shape: f32[2,384], index: 1, kind: input, shape index: {}]   ;;  %s3795_s2 = inlined_call_operand.vmem [shape: f32[1,384], index: 2, kind: input, shape index: {}]   ;;  %s3796_s3 = inlined_call_operand.hbm [shape: f32[128,384], index: 3, kind: input, shape index: {}]   ;;  %s3797_s4 = inlined_call_operand.vmem [shape: f32[1,384], index: 4, kind: input, shape index: {}]   ;;  %s3798_s5 = inlined_call_operand.vmem [shape: f32[1,128], index: 5, kind: input, shape index: {}]   ;;  %s3799_s6 = inlined_call_operand.<no memory space> [shape: f32[1], index: 6, kind: input, shape index: {}]   ;;  %s3800_s7 = inlined_call_operand.vmem [shape: f32[2,1], index: 7, kind: output, shape index: {}]  }
   0x1   :  { %s25_s25 = sshll.u32 %s3058_s24, 4  ;;  %s3034_s28 = scalar_lea.hbm %s3796_s3, 6144  ;;  %s26_s25 = int_to_ptr.vmem [resolvable:$true] %s25_s25 }
   0x2   :  { %p3035_p0 = scmp.ne.s32.totalorder %s3796_s3, %s3034_s28  ;;  %p3038_p1 = scmp.lt.u32.totalorder %s3034_s28, %s3796_s3 }
   0x4   :  { %p3040_p2 = pnand %p3038_p1, %p3035_p0 }
   0x6   :  { %3043 = shalt.err (!%p3040_p2)
}
   0x7   :  { %s3044_s10 = scalar_lea.vmem %s26_s25, 6144  ;;  %p3049_p4 = scmp.lt.s32.totalorder %s26_s25, %s26_s25 }
   0x8   :  { %p3045_p3 = scmp.ne.s32.totalorder %s26_s25, %s3044_s10  ;;  %p3050_p5 = scmp.lt.s32.totalorder %s3044_s10, %s3044_s10 }
   0xa   :  { %p3051_p6 = por %p3050_p5, %p3049_p4 }
   0xc   :  { %p3052_p7 = pnand %p3051_p6, %p3045_p3 }
   0xe   :  { %3055 = shalt.err (!%p3052_p7)
}
   0xf   :  { %s3059_s11 = smov 384   ;;  %s3060_s12 = smov 24  }
  0x10   :  { %31 = dma.hbm_to_vmem [thread:$0]  %s3796_s3, 6144, %s26_s25, [#allocation4], %s3059_s11, %s3059_s11, %s3060_s12  }
  0x11   :  { %3056 = dma.done.wait [#allocation4], 6144  }
  0x12   :  { %3057 = vsyncadd [#allocation4], 4294961152  ;;  %v3807_v0 = vmov 0.0|0.0   ;;  %v3805_v1 = vmov 0.0   ;;  %vm3063_vm0 = vmmov 0   ;;  %v3801_v2 = vmov 0  }
  0x13   :  { %2507 = vmatprep.subr.bf16.mxu1 %v3807_v0  ;;  %312 = vmatprep.mubr.f32.mxu0 %v3805_v1  ;;  %v3803_v3 = vmov 1   ;;  %v43_v4 = vld [vmem:[#allocation3 + $0x8] sm:$0xff]  ;;  %v46_v5 = vld [vmem:[#allocation3 + $0x20] sm:$0xff]  ;;  %v45_v8 = vld [vmem:[#allocation3 + $0x18] sm:$0xff]  ;;  %vm161_vm1 = vcmask 1041409   ;;  %vm2028_vm2 = vcmask 1041408  }
  0x14   :  { %2227 = vmatprep.mubr.msk.f32.mxu1 %vm3063_vm0, %v3805_v1  ;;  %2931 = vset.pattern.permute.xlu0 %v3801_v2  ;;  %v42_v6 = vld [vmem:[#allocation3] sm:$0xff]  ;;  %v3124_v7 = vpack.c.bf16 %v46_v5, %v43_v4  ;;  %v49_v9 = vld [vmem:[#allocation3 + $0x38] sm:$0xff]  ;;  %v52_v10 = vld [vmem:[#allocation3 + $0x50] sm:$0xff]  ;;  %vm2035_vm3 = vcmask 1024  }
  0x15   :  { %2932 = vset.pattern.permute.xlu1 %v3803_v3  ;;  %v3126_v11 = vpack.c.bf16 %v45_v8, %v42_v6  ;;  %v3128_v12 = vpack.c.bf16 %v52_v10, %v49_v9  ;;  %v48_v13 = vld [vmem:[#allocation3 + $0x30] sm:$0xff]  ;;  %v51_v14 = vld [vmem:[#allocation3 + $0x48] sm:$0xff]  ;;  %v58_v16 = vld [vmem:[#allocation3 + $0x80] sm:$0xff] }
  0x16   :  { %v55_v15 = vld [vmem:[#allocation3 + $0x68] sm:$0xff]  ;;  %2476 = vmatprep.subr.bf16.mxu0 %v3124_v7  ;;  %v3132_v17 = vpack.c.bf16 %v51_v14, %v48_v13  ;;  %v54_v19 = vld [vmem:[#allocation3 + $0x60] sm:$0xff]  ;;  %v57_v20 = vld [vmem:[#allocation3 + $0x78] sm:$0xff] }
  0x17   :  { %2478 = vmatpush1.bf16.msra.mxu0 %v3126_v11  ;;  %v3135_v18 = vpack.c.bf16 %v58_v16, %v55_v15  ;;  %v61_v21 = vld [vmem:[#allocation3 + $0x98] sm:$0xff]  ;;  %v64_v22 = vld [vmem:[#allocation3 + $0xb0] sm:$0xff]  ;;  %v3138_v23 = vpack.c.bf16 %v57_v20, %v54_v19  ;;  %v63_v26 = vld [vmem:[#allocation3 + $0xa8] sm:$0xff] }
  0x18   :  { %2480 = vmatprep.subr.bf16.mxu0 %v3128_v12  ;;  %v3141_v24 = vpack.c.bf16 %v64_v22, %v61_v21  ;;  %v60_v25 = vld [vmem:[#allocation3 + $0x90] sm:$0xff]  ;;  %v67_v27 = vld [vmem:[#allocation3 + $0xc8] sm:$0xff]  ;;  %v70_v28 = vld [vmem:[#allocation3 + $0xe0] sm:$0xff] }
  0x19   :  { %v44_v29 = vld [vmem:[#allocation3 + $0x10] sm:$0xff]  ;;  %v47_v30 = vld [vmem:[#allocation3 + $0x28] sm:$0xff]  ;;  %v50_v32 = vld [vmem:[#allocation3 + $0x40] sm:$0xff]  ;;  %v3146_v34 = vpack.c.bf16 %v63_v26, %v60_v25  ;;  %v3149_v35 = vpack.c.bf16 %v70_v28, %v67_v27  ;;  %v93_v27 = vlaneseq }
  0x1a   :  { %v3143_v31 = vpack.c.bf16 %v47_v30, %v44_v29  ;;  %v53_v33 = vld [vmem:[#allocation3 + $0x58] sm:$0xff]  ;;  %v66_v36 = vld [vmem:[#allocation3 + $0xc0] sm:$0xff]  ;;  %v76_v40 = vld [vmem:[#allocation3 + $0x110] sm:$0xff] }
  0x1b   :  { %2482 = vmatpush1.bf16.msra.mxu0 %v3132_v17  ;;  %v69_v37 = vld [vmem:[#allocation3 + $0xd8] sm:$0xff]  ;;  %v3152_v39 = vpack.c.bf16 %v53_v33, %v50_v32  ;;  %v56_v41 = vld [vmem:[#allocation3 + $0x70] sm:$0xff]  ;;  %v59_v42 = vld [vmem:[#allocation3 + $0x88] sm:$0xff]  ;;  %v94_v28 = vshrl.u32 %v93_v27, 7 }
  0x1c   :  { %2484 = vmatprep.subr.bf16.mxu0 %v3135_v18  ;;  %v73_v38 = vld [vmem:[#allocation3 + $0xf8] sm:$0xff]  ;;  %2509 = vmatpush3.bf16.msra.mxu1 %v3143_v31  ;;  %v3156_v43 = vpack.c.bf16 %v69_v37, %v66_v36  ;;  %v109_v44 = vld [vmem:[%s3793_s0 + $0x8] sm:$0x1]  ;;  %v72_v46 = vld [vmem:[#allocation3 + $0xf0] sm:$0xff]  ;;  %v3165_v49 = vpack.c.bf16 %v59_v42, %v56_v41 }
  0x1d   :  { %2510 = vmatprep.subr.bf16.mxu1 %v3807_v0  ;;  %v3162_v45 = vpack.c.bf16 %v76_v40, %v73_v38  ;;  %v75_v47 = vld [vmem:[#allocation3 + $0x108] sm:$0xff]  ;;  %v82_v50 = vld [vmem:[#allocation3 + $0x140] sm:$0xff]  ;;  %v65_v52 = vld [vmem:[#allocation3 + $0xb8] sm:$0xff]  ;;  %117 = vperm.xlu0 %2931, %v109_v44   ;;  %v95_v29 = vsub.s32 0, %v94_v28  ;;  %v3262_v32 = vsub.s32 2, %v94_v28  ;;  %v99_v36 = vsub.s32 1, %v94_v28 }
  0x1e   :  { %v79_v48 = vld [vmem:[#allocation3 + $0x128] sm:$0xff]  ;;  %v62_v51 = vld [vmem:[#allocation3 + $0xa0] sm:$0xff]  ;;  %178 = vperm.xlu1 %2932, %v109_v44   ;;  %v3172_v54 = vpack.c.bf16 %v75_v47, %v72_v46  ;;  %v81_v57 = vld [vmem:[#allocation3 + $0x138] sm:$0xff]  ;;  %v187_v38 = vsub.s32 3, %v94_v28 }
  0x1f   :  { %2486 = vmatpush1.bf16.msra.mxu0 %v3138_v23  ;;  %v108_v53 = vld [vmem:[%s3793_s0] sm:$0x1]  ;;  %v3175_v55 = vpack.c.bf16 %v82_v50, %v79_v48  ;;  %v85_v58 = vld [vmem:[#allocation3 + $0x158] sm:$0xff]  ;;  %v3178_v59 = vpack.c.bf16 %v65_v52, %v62_v51  ;;  %v88_v60 = vld [vmem:[#allocation3 + $0x170] sm:$0xff] }
  0x20   :  { %2488 = vmatprep.subr.bf16.mxu0 %v3141_v24  ;;  %2512 = vmatpush3.bf16.msra.mxu1 %v3152_v39  ;;  %v78_v56 = vld [vmem:[#allocation3 + $0x120] sm:$0xff]  ;;  %v68_v61 = vld [vmem:[#allocation3 + $0xd0] sm:$0xff]  ;;  %v71_v62 = vld [vmem:[#allocation3 + $0xe8] sm:$0xff]  ;;  %v3188_v5 = vpack.c.bf16 %v88_v60, %v85_v58 }
  0x21   :  { %2513 = vmatprep.subr.bf16.mxu1 %v3807_v0  ;;  %112 = vperm.xlu0 %2931, %v108_v53   ;;  %v411_v63 = vld [vmem:[%s3793_s0 + $0x9] sm:$0x1]  ;;  %v3185_v4 = vpack.c.bf16 %v81_v57, %v78_v56  ;;  %v84_v6 = vld [vmem:[#allocation3 + $0x150] sm:$0xff]  ;;  %v3191_v9 = vpack.c.bf16 %v71_v62, %v68_v61  ;;  %v410_v10 = vld [vmem:[%s3793_s0 + $0x1] sm:$0x1] }
  0x22   :  { %174 = vperm.xlu1 %2932, %v108_v53   ;;  %v87_v8 = vld [vmem:[#allocation3 + $0x168] sm:$0xff]  ;;  %v74_v13 = vld [vmem:[#allocation3 + $0x100] sm:$0xff]  ;;  %v77_v14 = vld [vmem:[#allocation3 + $0x118] sm:$0xff] }
  0x23   :  { %2490 = vmatpush1.bf16.msra.mxu0 %v3146_v34  ;;  %v3199_v15 = vpack.c.bf16 %v87_v8, %v84_v6  ;;  %v3203_v16 = vpack.c.bf16 %v77_v14, %v74_v13  ;;  %v80_v19 = vld [vmem:[#allocation3 + $0x130] sm:$0xff]  ;;  %v83_v20 = vld [vmem:[#allocation3 + $0x148] sm:$0xff]  ;;  %v86_v22 = vld [vmem:[#allocation3 + $0x160] sm:$0xff] }
  0x24   :  { %2492 = vmatprep.subr.bf16.mxu0 %v3149_v35  ;;  %2515 = vmatpush3.bf16.msra.mxu1 %v3165_v49  ;;  %v3210_v21 = vpack.c.bf16 %v83_v20, %v80_v19  ;;  %v89_v25 = vld [vmem:[#allocation3 + $0x178] sm:$0xff]  ;;  %v41_v30 = vld [vmem:[%s3794_s1] sm:$0x3f] }
  0x25   :  { %2516 = vmatprep.subr.bf16.mxu1 %v3807_v0  ;;  %419 = vperm.xlu0 %2931, %v411_v63   ;;  %v3219_v26 = vpack.c.bf16 %v89_v25, %v86_v22  ;;  %v124_v33 = vrot.slane %v41_v30, %v95_v29  ;;  %v128_v37 = vrot.slane %v41_v30, %v3262_v32  ;;  %v91_v60 = vld [vmem:[%s3795_s2] sm:$0x7] }
  0x26   :  { %2933 = vset.pattern.permute.xlu1 %v3801_v2  ;;  %v184_v41 = vrot.slane %v41_v30, %v99_v36  ;;  %v188_v46 = vrot.slane %v41_v30, %v187_v38  ;;  %v90_v8 = vld [vmem:[%s3797_s4] sm:$0x7]  ;;  %v3291_v22 = vrot.slane %v91_v60, %v99_v36 }
  0x27   :  { %2494 = vmatpush1.bf16.msra.mxu0 %v3156_v43  ;;  %414 = vperm.xlu1 %2933, %v410_v10   ;;  %v3265_v40 = vrot.slane %v124_v33, %v95_v29  ;;  %v3267_v44 = vrot.slane %v128_v37, %v95_v29  ;;  %v3289_v20 = vrot.slane %v90_v8, %v95_v29 }
  0x28   :  { %2496 = vmatprep.subr.bf16.mxu0 %v3162_v45  ;;  %2518 = vmatpush3.bf16.msra.mxu1 %v3178_v59  ;;  %v3270_v48 = vrot.slane %v184_v41, %v99_v36  ;;  %v3273_v52 = vrot.slane %v188_v46, %v99_v36  ;;  %v3297_v41 = vrot.slane %v90_v8, %v99_v36 }
  0x29   :  { %2519 = vmatprep.subr.bf16.mxu1 %v3807_v0  ;;  %2934 = vset.pattern.permute.xlu0 %v3803_v3 }
  0x2a   :  { %451 = vperm.xlu0 %2934, %v411_v63  }
  0x2b   :  { %2498 = vmatpush1.bf16.msra.mxu0 %v3172_v54  ;;  %2935 = vset.pattern.permute.xlu1 %v3803_v3  ;;  %v131_v3 = vsub.s32 4, %v94_v28 }
  0x2c   :  { %2500 = vmatprep.subr.bf16.mxu0 %v3175_v55  ;;  %2521 = vmatpush3.bf16.msra.mxu1 %v3191_v9 }
  0x2d   :  { %2522 = vmatprep.subr.bf16.mxu1 %v3807_v0  ;;  %447 = vperm.xlu1 %2935, %v410_v10   ;;  %v3285_v10 = vrot.slane %v91_v60, %v95_v29 }
  0x2e   :  { %2937 = vset.pattern.permute.xlu0 %v3801_v2 }
  0x2f   :  { %2502 = vmatpush1.bf16.msra.mxu0 %v3185_v4  ;;  %3815 = vst [vmem:[#allocation6_spill] sm:$0xff] %v3285_v10 }
  0x30   :  { %2504 = vmatprep.subr.bf16.mxu0 %v3188_v5  ;;  %2524 = vmatpush3.bf16.msra.mxu1 %v3203_v16 }
  0x31   :  { %2525 = vmatprep.subr.bf16.mxu1 %v3807_v0  ;;  %2936 = vset.pattern.permute.xlu1 %v3801_v2 }
  0x33   :  { %2506 = vmatpush1.bf16.msra.mxu0 %v3199_v15 }
  0x34   :  { %2532 = vmatprep.subr.bf16.mxu0 %v3124_v7  ;;  %2527 = vmatpush3.bf16.msra.mxu1 %v3210_v21 }
  0x35   :  { %2528 = vmatprep.subr.bf16.mxu1 %v3807_v0 }
  0x36   :  { %313 = vmatmul.mubr.f32.vlgmr.msra.gmra.mrb[0].mxu0 %v3805_v1 }
  0x37   :  { %2534 = vmatpush1.bf16.msra.mxu0 %v3126_v11  ;;  %542 = vmatprep.mubr.f32.mxu0 %v3805_v1 }
  0x38   :  { %2536 = vmatprep.subr.bf16.mxu0 %v3128_v12  ;;  %2530 = vmatpush3.bf16.msra.mxu1 %v3219_v26 }
  0x39   :  { %2563 = vmatprep.subr.bf16.mxu1 %v3807_v0 }
  0x3b   :  { %2538 = vmatpush1.bf16.msra.mxu0 %v3132_v17  ;;  %2228 = vmatmul.mubr.f32.vlgmr.msra.gmra.mrb[0].mxu1 %v3805_v1 }
  0x3c   :  { %2540 = vmatprep.subr.bf16.mxu0 %v3135_v18  ;;  %2565 = vmatpush3.bf16.msra.mxu1 %v3143_v31 }
  0x3d   :  { %2566 = vmatprep.subr.bf16.mxu1 %v3807_v0  ;;  %2262 = vmatprep.mubr.msk.f32.mxu1 %vm3063_vm0, %v3805_v1 }
  0x3f   :  { %2542 = vmatpush1.bf16.msra.mxu0 %v3138_v23 }
  0x40   :  { %2544 = vmatprep.subr.bf16.mxu0 %v3141_v24  ;;  %2568 = vmatpush3.bf16.msra.mxu1 %v3152_v39 }
  0x41   :  { %2569 = vmatprep.subr.bf16.mxu1 %v3807_v0 }
  0x43   :  { %2546 = vmatpush1.bf16.msra.mxu0 %v3146_v34 }
  0x44   :  { %2548 = vmatprep.subr.bf16.mxu0 %v3149_v35  ;;  %2571 = vmatpush3.bf16.msra.mxu1 %v3165_v49 }
  0x45   :  { %2572 = vmatprep.subr.bf16.mxu1 %v3807_v0 }
  0x47   :  { %2550 = vmatpush1.bf16.msra.mxu0 %v3156_v43 }
  0x48   :  { %2552 = vmatprep.subr.bf16.mxu0 %v3162_v45  ;;  %2574 = vmatpush3.bf16.msra.mxu1 %v3178_v59 }
  0x49   :  { %2575 = vmatprep.subr.bf16.mxu1 %v3807_v0 }
  0x4b   :  { %2554 = vmatpush1.bf16.msra.mxu0 %v3172_v54 }
  0x4c   :  { %2556 = vmatprep.subr.bf16.mxu0 %v3175_v55  ;;  %2577 = vmatpush3.bf16.msra.mxu1 %v3191_v9 }
  0x4d   :  { %2578 = vmatprep.subr.bf16.mxu1 %v3807_v0 }
  0x4f   :  { %2558 = vmatpush1.bf16.msra.mxu0 %v3185_v4 }
  0x50   :  { %2560 = vmatprep.subr.bf16.mxu0 %v3188_v5  ;;  %2580 = vmatpush3.bf16.msra.mxu1 %v3203_v16 }
  0x51   :  { %2581 = vmatprep.subr.bf16.mxu1 %v3807_v0 }
  0x53   :  { %2562 = vmatpush1.bf16.msra.mxu0 %v3199_v15 }
  0x54   :  { %2588 = vmatprep.subr.bf16.mxu0 %v3124_v7  ;;  %2583 = vmatpush3.bf16.msra.mxu1 %v3210_v21 }
  0x55   :  { %2584 = vmatprep.subr.bf16.mxu1 %v3807_v0 }
  0x58   :  { %2586 = vmatpush3.bf16.msra.mxu1 %v3219_v26 }
  0x59   :  { %2619 = vmatprep.subr.bf16.mxu1 %v3807_v0 }
  0x9c   :  { %v118_v42 = vpop.permute.xlu0 %117 }
  0x9d   :  { %v151_v47 = vmul.f32 %v3265_v40, %v118_v42  ;;  %v179_v50 = vpop.permute.xlu1 %178  ;;  %v152_v51 = vmul.f32 %v3267_v44, %v118_v42 }
  0x9e   :  { %v211_v57 = vmul.f32 %v3270_v48, %v179_v50  ;;  %v212_v62 = vmul.f32 %v3273_v52, %v179_v50 }
  0x9f   :  { %v160_v56 = vrot.slane %v151_v47, 7  ;;  %v163_v61 = vrot.slane %v152_v51, 7 }
  0xa0   :  { %v113_v53 = vpop.permute.xlu0 %112  ;;  %v220_v13 = vrot.slane %v211_v57, 7  ;;  %v222_v25 = vrot.slane %v212_v62, 7 }
  0xa1   :  { %v148_v58 = vmul.f32 %v3265_v40, %v113_v53  ;;  %v149_v63 = vmul.f32 %v3267_v44, %v113_v53  ;;  %v175_v6 = vpop.permute.xlu1 %174 }
  0xa2   :  { %v208_v14 = vmul.f32 %v3270_v48, %v175_v6  ;;  %v209_v27 = vmul.f32 %v3273_v52, %v175_v6 }
  0xa3   :  { %v162_v19 = vsel %vm161_vm1, %v160_v56, %v148_v58  ;;  %v164_v37 = vsel %vm161_vm1, %v163_v61, %v149_v63  ;;  %v132_v63 = vrot.slane %v41_v30, %v131_v3  ;;  %v3311_v3 = vrot.slane %v91_v60, %v3262_v32 }
  0xa4   :  { %v170_v33 = vadd.f32 %v162_v19, %v3285_v10  ;;  %v221_v38 = vsel %vm161_vm1, %v220_v13, %v208_v14  ;;  %v171_v47 = vadd.f32 %v164_v37, %v3291_v22  ;;  %v223_v57 = vsel %vm161_vm1, %v222_v25, %v209_v27 }
  0xa5   :  { %v191_v13 = vsub.s32 5, %v94_v28  ;;  %v3303_v37 = vrot.slane %v132_v63, %v95_v29  ;;  %v3314_v28 = vrot.slane %v90_v8, %v3262_v32  ;;  %v3817_v63 = vmov 0.0  }
  0xa6   :  { %v229_v51 = vadd.f32 %v221_v38, %v170_v33  ;;  %v230_v19 = vadd.f32 %v223_v57, %v171_v47 }
  0xa7   :  { %v192_v33 = vrot.slane %v41_v30, %v191_v13  ;;  %v153_v25 = vmul.f32 %v3303_v37, %v118_v42  ;;  %v641_v13 = vld [vmem:[%s3793_s0 + $0xa] sm:$0x1] }
  0xa8   :  { %649 = vperm.xlu1 %2936, %v641_v13  }
  0xa9   :  { %v3306_v27 = vrot.slane %v192_v33, %v99_v36  ;;  %v871_v33 = vld [vmem:[%s3793_s0 + $0xb] sm:$0x1] }
  0xab   :  { %v210_v36 = vmul.f32 %v3306_v27, %v175_v6  ;;  %v3816_v6 = vmov 0.0|0.0  }
 0x109   :  { %v314_v46 = vpop.f32.mrb[0].mxu0 }
 0x10a   :  { %v315_v56 = vadd.f32 %v314_v46, %v3289_v20  ;;  %v316_v58 = vpop.f32.mrb[1].mxu0 }
 0x10b   :  { %v317_v62 = vadd.f32 %v316_v58, %v3297_v41 }
 0x10c   :  { %v389_v2 = vadd.f32 %v315_v56, %v229_v51  ;;  %v165_v51 = vrot.slane %v153_v25, 7  ;;  %v3818_v25 = vmov 1  }
 0x10d   :  { %v390_v61 = vadd.f32 %v317_v62, %v230_v19  ;;  %2938 = vset.pattern.permute.xlu1 %v3818_v25 }
 0x10e   :  { %v2042_v1 = vmul.f32 -1.442695, %v389_v2  ;;  %v385_v14 = vpop.f32.mrb[0].mxu1  ;;  %v213_v2 = vmul.f32 %v3306_v27, %v179_v50  ;;  %681 = vperm.xlu1 %2938, %v641_v13  }
 0x10f   :  { %v2043_v0 = vmul.f32 -1.442695, %v390_v61  ;;  %v2229_v10 = vpop.f32.mrb[1].mxu1  ;;  %v386_v50 = vadd.f32 %v385_v14, %v3314_v28  ;;  %v640_v14 = vld [vmem:[%s3793_s0 + $0x2] sm:$0x1] }
 0x110   :  { %2954 = vpow2.f32 %v2042_v1  ;;  %v150_v1 = vmul.f32 %v3303_v37, %v113_v53  ;;  %644 = vperm.xlu0 %2937, %v640_v14  }
 0x111   :  { %2956 = vpow2.f32 %v2043_v0  ;;  %v224_v0 = vrot.slane %v213_v2, 7  ;;  %v415_v2 = vpop.permute.xlu1 %414 }
 0x112   :  { %v166_v30 = vsel %vm161_vm1, %v165_v51, %v150_v1  ;;  %677 = vperm.xlu1 %2938, %v640_v14   ;;  %v420_v51 = vpop.permute.xlu0 %419 }
 0x113   :  { %v172_v10 = vadd.f32 %v166_v30, %v3311_v3  ;;  %v225_v53 = vsel %vm161_vm1, %v224_v0, %v210_v36  ;;  %v425_v1 = vmul.f32 %v420_v51, %v3265_v40  ;;  %v426_v0 = vmul.f32 %v420_v51, %v3267_v44 }
 0x114   :  { %879 = vperm.xlu0 %2937, %v871_v33   ;;  %v422_v36 = vmul.f32 %v415_v2, %v3265_v40 }
 0x115   :  { %v231_v60 = vadd.f32 %v225_v53, %v172_v10  ;;  %v434_v30 = vrot.slane %v425_v1, 7  ;;  %v448_v10 = vpop.permute.xlu1 %447  ;;  %v423_v53 = vmul.f32 %v415_v2, %v3267_v44 }
 0x118   :  { %2940 = vset.pattern.permute.xlu0 %v3818_v25 }
 0x119   :  { %911 = vperm.xlu0 %2940, %v871_v33  }
 0x11a   :  { %v2955_v38 = vpop.eup %2954 }
 0x11b   :  { %v397_v46 = vadd.f32 1.0, %v2955_v38  ;;  %v2957_v29 = vpop.eup %2956  ;;  %v870_v38 = vld [vmem:[%s3793_s0 + $0x3] sm:$0x1] }
 0x11c   :  { %v398_v42 = vadd.f32 1.0, %v2957_v29  ;;  %v452_v29 = vpop.permute.xlu0 %451 }
 0x11d   :  { %2958 = vrcp.f32 %v397_v46  ;;  %v3819_v46 = vmov 0  }
 0x11e   :  { %2960 = vrcp.f32 %v398_v42  ;;  %2939 = vset.pattern.permute.xlu1 %v3819_v46  ;;  %2943 = vset.pattern.permute.xlu0 %v3819_v46  ;;  %v457_v42 = vmul.f32 %v452_v29, %v3270_v48 }
 0x11f   :  { %874 = vperm.xlu1 %2939, %v870_v38  }
 0x123   :  { %2941 = vset.pattern.permute.xlu1 %v3818_v25 }
 0x124   :  { %907 = vperm.xlu1 %2941, %v870_v38  }
 0x127   :  { %v2959_v47 = vpop.eup %2958 }
 0x128   :  { %v403_v56 = vmul.f32 %v2959_v47, %v386_v50  ;;  %v2961_v32 = vpop.eup %2960  ;;  %2942 = vset.pattern.permute.xlu1 %v3819_v46  ;;  %v436_v50 = vrot.slane %v426_v0, 7  ;;  %v458_v47 = vmul.f32 %v452_v29, %v3273_v52 }
 0x129   :  { %v406_v8 = vsub.f32 1.0, %v2961_v32  ;;  %v408_v19 = vmul.f32 0.0, %v2961_v32 }
 0x12a   :  { %v404_v57 = vadd.f32 %v403_v56, %v231_v60  ;;  %v466_v60 = vrot.slane %v457_v42, 7  ;;  %v454_v56 = vmul.f32 %v448_v10, %v3270_v48  ;;  %v468_v32 = vrot.slane %v458_v47, 7 }
 0x12c   :  { %2962 = vtanh.f32 %v404_v57  ;;  %v435_v57 = vsel %vm161_vm1, %v434_v30, %v422_v36  ;;  %v467_v13 = vsel %vm161_vm1, %v466_v60, %v454_v56 }
 0x136   :  { %v2963_v58 = vpop.eup %2962 }
 0x137   :  { %v407_v62 = vmul.f32 %v2963_v58, %v406_v8  ;;  %v455_v8 = vmul.f32 %v448_v10, %v3273_v52  ;;  %v3820_v58 = vld [vmem:[#allocation6_spill] sm:$0xff] }
 0x139   :  { %v3321_v61 = vadd.f32 %v408_v19, %v407_v62  ;;  %v443_v62 = vadd.f32 %v435_v57, %v3820_v58  ;;  %v437_v19 = vsel %vm161_vm1, %v436_v50, %v423_v53  ;;  %v469_v42 = vsel %vm161_vm1, %v468_v32, %v455_v8 }
 0x13a   :  { %v444_v38 = vadd.f32 %v437_v19, %v3291_v22  ;;  %v427_v53 = vmul.f32 %v420_v51, %v3303_v37  ;;  %v424_v19 = vmul.f32 %v415_v2, %v3303_v37  ;;  %v459_v32 = vmul.f32 %v452_v29, %v3306_v27 }
 0x13b   :  { %543 = vmatmul.mubr.f32.vlgmr.msra.gmra.mrb[2].mxu0 %v3321_v61  ;;  %2263 = vmatmul.mubr.f32.vlgmr.msra.gmra.mrb[2].mxu1 %v3321_v61  ;;  %v475_v1 = vadd.f32 %v467_v13, %v443_v62 }
 0x13c   :  { %2590 = vmatpush1.bf16.msra.mxu0 %v3126_v11  ;;  %2621 = vmatpush3.bf16.msra.mxu1 %v3143_v31  ;;  %v476_v25 = vadd.f32 %v469_v42, %v444_v38  ;;  %v438_v62 = vrot.slane %v427_v53, 7  ;;  %v470_v13 = vrot.slane %v459_v32, 7 }
 0x13d   :  { %2592 = vmatprep.subr.bf16.mxu0 %v3128_v12  ;;  %2622 = vmatprep.subr.bf16.mxu1 %v3816_v6 }
 0x13e   :  { %772 = vmatprep.mubr.f32.mxu0 %v3817_v63  ;;  %2297 = vmatprep.mubr.msk.f32.mxu1 %vm3063_vm0, %v3817_v63 }
 0x140   :  { %2594 = vmatpush1.bf16.msra.mxu0 %v3132_v17  ;;  %2624 = vmatpush3.bf16.msra.mxu1 %v3152_v39 }
 0x141   :  { %2596 = vmatprep.subr.bf16.mxu0 %v3135_v18  ;;  %2625 = vmatprep.subr.bf16.mxu1 %v3816_v6 }
 0x144   :  { %2598 = vmatpush1.bf16.msra.mxu0 %v3138_v23  ;;  %2627 = vmatpush3.bf16.msra.mxu1 %v3165_v49 }
 0x145   :  { %2600 = vmatprep.subr.bf16.mxu0 %v3141_v24  ;;  %2628 = vmatprep.subr.bf16.mxu1 %v3816_v6 }
 0x148   :  { %2602 = vmatpush1.bf16.msra.mxu0 %v3146_v34  ;;  %2630 = vmatpush3.bf16.msra.mxu1 %v3178_v59 }
 0x149   :  { %2604 = vmatprep.subr.bf16.mxu0 %v3149_v35  ;;  %2631 = vmatprep.subr.bf16.mxu1 %v3816_v6 }
 0x14c   :  { %2606 = vmatpush1.bf16.msra.mxu0 %v3156_v43  ;;  %2633 = vmatpush3.bf16.msra.mxu1 %v3191_v9 }
 0x14d   :  { %2608 = vmatprep.subr.bf16.mxu0 %v3162_v45  ;;  %2634 = vmatprep.subr.bf16.mxu1 %v3816_v6 }
 0x150   :  { %2610 = vmatpush1.bf16.msra.mxu0 %v3172_v54  ;;  %2636 = vmatpush3.bf16.msra.mxu1 %v3203_v16 }
 0x151   :  { %2612 = vmatprep.subr.bf16.mxu0 %v3175_v55  ;;  %2637 = vmatprep.subr.bf16.mxu1 %v3816_v6 }
 0x154   :  { %2614 = vmatpush1.bf16.msra.mxu0 %v3185_v4  ;;  %2639 = vmatpush3.bf16.msra.mxu1 %v3210_v21 }
 0x155   :  { %2616 = vmatprep.subr.bf16.mxu0 %v3188_v5  ;;  %2640 = vmatprep.subr.bf16.mxu1 %v3816_v6 }
 0x158   :  { %2618 = vmatpush1.bf16.msra.mxu0 %v3199_v15  ;;  %2642 = vmatpush3.bf16.msra.mxu1 %v3219_v26 }
 0x159   :  { %2644 = vmatprep.subr.bf16.mxu0 %v3124_v7  ;;  %2675 = vmatprep.subr.bf16.mxu1 %v3816_v6 }
 0x18f   :  { %v645_v53 = vpop.permute.xlu0 %644 }
 0x20e   :  { %v544_v14 = vpop.f32.mrb[2].mxu0  ;;  %v615_v33 = vpop.f32.mrb[2].mxu1 }
 0x20f   :  { %v545_v0 = vadd.f32 %v544_v14, %v3289_v20  ;;  %v546_v46 = vpop.f32.mrb[3].mxu0  ;;  %v2264_v30 = vpop.f32.mrb[3].mxu1  ;;  %v456_v14 = vmul.f32 %v448_v10, %v3306_v27  ;;  %v616_v51 = vadd.f32 %v615_v33, %v3314_v28 }
 0x210   :  { %v547_v36 = vadd.f32 %v546_v46, %v3297_v41  ;;  %v439_v46 = vsel %vm161_vm1, %v438_v62, %v424_v19  ;;  %v652_v19 = vmul.f32 %v645_v53, %v3265_v40 }
 0x211   :  { %v619_v47 = vadd.f32 %v545_v0, %v475_v1  ;;  %v471_v38 = vsel %vm161_vm1, %v470_v13, %v456_v14  ;;  %v653_v13 = vmul.f32 %v645_v53, %v3267_v44 }
 0x212   :  { %v620_v58 = vadd.f32 %v547_v36, %v476_v25  ;;  %v445_v25 = vadd.f32 %v439_v46, %v3311_v3 }
 0x213   :  { %v2044_v57 = vmul.f32 -1.442695, %v619_v47 }
 0x214   :  { %v2045_v50 = vmul.f32 -1.442695, %v620_v58  ;;  %v477_v0 = vadd.f32 %v471_v38, %v445_v25 }
 0x215   :  { %2964 = vpow2.f32 %v2044_v57 }
 0x216   :  { %2966 = vpow2.f32 %v2045_v50 }
 0x21f   :  { %v2965_v60 = vpop.eup %2964 }
 0x220   :  { %v627_v56 = vadd.f32 1.0, %v2965_v60  ;;  %v2967_v8 = vpop.eup %2966 }
 0x221   :  { %v628_v58 = vadd.f32 1.0, %v2967_v8 }
 0x222   :  { %2968 = vrcp.f32 %v627_v56 }
 0x223   :  { %2970 = vrcp.f32 %v628_v58 }
 0x22c   :  { %v2969_v1 = vpop.eup %2968 }
 0x22d   :  { %v633_v42 = vmul.f32 %v2969_v1, %v616_v51  ;;  %v2971_v29 = vpop.eup %2970  ;;  %v3821_v1 = vld [vmem:[#allocation6_spill] sm:$0xff] }
 0x22e   :  { %v636_v30 = vsub.f32 1.0, %v2971_v29  ;;  %v638_v57 = vmul.f32 %v2971_v29, %v3321_v61  ;;  %v650_v61 = vpop.permute.xlu1 %649 }
 0x22f   :  { %v634_v2 = vadd.f32 %v633_v42, %v477_v0  ;;  %v655_v50 = vmul.f32 %v650_v61, %v3265_v40  ;;  %v656_v60 = vmul.f32 %v650_v61, %v3267_v44 }
 0x231   :  { %2972 = vtanh.f32 %v634_v2  ;;  %v664_v56 = vrot.slane %v655_v50, 7  ;;  %v666_v8 = vrot.slane %v656_v60, 7 }
 0x232   :  { %v682_v33 = vpop.permute.xlu1 %681 }
 0x233   :  { %v687_v62 = vmul.f32 %v682_v33, %v3270_v48  ;;  %v688_v46 = vmul.f32 %v682_v33, %v3273_v52  ;;  %v665_v58 = vsel %vm161_vm1, %v664_v56, %v652_v19  ;;  %v667_v42 = vsel %vm161_vm1, %v666_v8, %v653_v13 }
 0x234   :  { %v673_v0 = vadd.f32 %v665_v58, %v3821_v1  ;;  %v657_v13 = vmul.f32 %v650_v61, %v3303_v37 }
 0x235   :  { %v696_v14 = vrot.slane %v687_v62, 7  ;;  %v698_v38 = vrot.slane %v688_v46, 7 }
 0x236   :  { %v678_v32 = vpop.permute.xlu1 %677 }
 0x237   :  { %v684_v25 = vmul.f32 %v678_v32, %v3270_v48  ;;  %v685_v51 = vmul.f32 %v678_v32, %v3273_v52 }
 0x239   :  { %v697_v2 = vsel %vm161_vm1, %v696_v14, %v684_v25  ;;  %v699_v50 = vsel %vm161_vm1, %v698_v38, %v685_v51  ;;  %v654_v38 = vmul.f32 %v645_v53, %v3303_v37 }
 0x23b   :  { %v2973_v36 = vpop.eup %2972 }
 0x23c   :  { %v637_v47 = vmul.f32 %v2973_v36, %v636_v30  ;;  %v674_v36 = vadd.f32 %v667_v42, %v3291_v22  ;;  %v689_v42 = vmul.f32 %v682_v33, %v3306_v27 }
 0x23e   :  { %v3403_v10 = vadd.f32 %v638_v57, %v637_v47  ;;  %v705_v47 = vadd.f32 %v697_v2, %v673_v0  ;;  %v706_v46 = vadd.f32 %v699_v50, %v674_v36  ;;  %v668_v0 = vrot.slane %v657_v13, 7 }
 0x23f   :  { %v700_v2 = vrot.slane %v689_v42, 7  ;;  %v686_v36 = vmul.f32 %v678_v32, %v3306_v27  ;;  %v3822_v13 = vmov 1   ;;  %v875_v42 = vpop.permute.xlu1 %874 }
 0x240   :  { %773 = vmatmul.mubr.f32.vlgmr.msra.gmra.mrb[4].mxu0 %v3403_v10  ;;  %2298 = vmatmul.mubr.f32.vlgmr.msra.gmra.mrb[4].mxu1 %v3403_v10 }
 0x241   :  { %2646 = vmatpush1.bf16.msra.mxu0 %v3126_v11  ;;  %2677 = vmatpush3.bf16.msra.mxu1 %v3143_v31 }
 0x242   :  { %2648 = vmatprep.subr.bf16.mxu0 %v3128_v12  ;;  %2678 = vmatprep.subr.bf16.mxu1 %v3816_v6 }
 0x243   :  { %1002 = vmatprep.mubr.f32.mxu0 %v3817_v63  ;;  %2332 = vmatprep.mubr.msk.f32.mxu1 %vm3063_vm0, %v3817_v63 }
 0x245   :  { %2650 = vmatpush1.bf16.msra.mxu0 %v3132_v17  ;;  %2680 = vmatpush3.bf16.msra.mxu1 %v3152_v39 }
 0x246   :  { %2652 = vmatprep.subr.bf16.mxu0 %v3135_v18  ;;  %2681 = vmatprep.subr.bf16.mxu1 %v3816_v6 }
 0x249   :  { %2654 = vmatpush1.bf16.msra.mxu0 %v3138_v23  ;;  %2683 = vmatpush3.bf16.msra.mxu1 %v3165_v49 }
 0x24a   :  { %2656 = vmatprep.subr.bf16.mxu0 %v3141_v24  ;;  %2684 = vmatprep.subr.bf16.mxu1 %v3816_v6 }
 0x24d   :  { %2658 = vmatpush1.bf16.msra.mxu0 %v3146_v34  ;;  %2686 = vmatpush3.bf16.msra.mxu1 %v3178_v59 }
 0x24e   :  { %2660 = vmatprep.subr.bf16.mxu0 %v3149_v35  ;;  %2687 = vmatprep.subr.bf16.mxu1 %v3816_v6 }
 0x251   :  { %2662 = vmatpush1.bf16.msra.mxu0 %v3156_v43  ;;  %2689 = vmatpush3.bf16.msra.mxu1 %v3191_v9 }
 0x252   :  { %2664 = vmatprep.subr.bf16.mxu0 %v3162_v45  ;;  %2690 = vmatprep.subr.bf16.mxu1 %v3816_v6 }
 0x255   :  { %2666 = vmatpush1.bf16.msra.mxu0 %v3172_v54  ;;  %2692 = vmatpush3.bf16.msra.mxu1 %v3203_v16 }
 0x256   :  { %2668 = vmatprep.subr.bf16.mxu0 %v3175_v55  ;;  %2693 = vmatprep.subr.bf16.mxu1 %v3816_v6 }
 0x259   :  { %2670 = vmatpush1.bf16.msra.mxu0 %v3185_v4  ;;  %2695 = vmatpush3.bf16.msra.mxu1 %v3210_v21 }
 0x25a   :  { %2672 = vmatprep.subr.bf16.mxu0 %v3188_v5  ;;  %2696 = vmatprep.subr.bf16.mxu1 %v3816_v6 }
 0x25d   :  { %2674 = vmatpush1.bf16.msra.mxu0 %v3199_v15  ;;  %2698 = vmatpush3.bf16.msra.mxu1 %v3219_v26 }
 0x25e   :  { %2700 = vmatprep.subr.bf16.mxu0 %v3124_v7  ;;  %2731 = vmatprep.subr.bf16.mxu1 %v3816_v6 }
 0x313   :  { %v774_v29 = vpop.f32.mrb[4].mxu0  ;;  %v845_v30 = vpop.f32.mrb[4].mxu1 }
 0x314   :  { %v775_v57 = vadd.f32 %v774_v29, %v3289_v20  ;;  %v776_v60 = vpop.f32.mrb[5].mxu0  ;;  %v2299_v56 = vpop.f32.mrb[5].mxu1  ;;  %v669_v29 = vsel %vm161_vm1, %v668_v0, %v654_v38  ;;  %v846_v61 = vadd.f32 %v845_v30, %v3314_v28  ;;  %v1100_v30 = vld [vmem:[%s3793_s0 + $0x4] sm:$0x1] }
 0x315   :  { %v777_v62 = vadd.f32 %v776_v60, %v3297_v41  ;;  %1104 = vperm.xlu0 %2943, %v1100_v30   ;;  %v880_v0 = vpop.permute.xlu0 %879 }
 0x316   :  { %v849_v19 = vadd.f32 %v775_v57, %v705_v47  ;;  %v675_v47 = vadd.f32 %v669_v29, %v3311_v3  ;;  %v701_v57 = vsel %vm161_vm1, %v700_v2, %v686_v36  ;;  %v885_v38 = vmul.f32 %v880_v0, %v3265_v40 }
 0x317   :  { %v850_v1 = vadd.f32 %v777_v62, %v706_v46  ;;  %v886_v2 = vmul.f32 %v880_v0, %v3267_v44  ;;  %v882_v36 = vmul.f32 %v875_v42, %v3265_v40 }
 0x318   :  { %v2046_v58 = vmul.f32 -1.442695, %v849_v19  ;;  %v707_v60 = vadd.f32 %v701_v57, %v675_v47  ;;  %v894_v29 = vrot.slane %v885_v38, 7 }
 0x319   :  { %v2047_v8 = vmul.f32 -1.442695, %v850_v1  ;;  %v896_v57 = vrot.slane %v886_v2, 7 }
 0x31a   :  { %2974 = vpow2.f32 %v2046_v58 }
 0x31b   :  { %2976 = vpow2.f32 %v2047_v8  ;;  %v1331_v8 = vld [vmem:[%s3793_s0 + $0xd] sm:$0x1] }
 0x31c   :  { %1339 = vperm.xlu0 %2943, %v1331_v8  }
 0x320   :  { %2946 = vset.pattern.permute.xlu0 %v3822_v13 }
 0x321   :  { %1371 = vperm.xlu0 %2946, %v1331_v8  }
 0x324   :  { %v2975_v14 = vpop.eup %2974 }
 0x325   :  { %v857_v25 = vadd.f32 1.0, %v2975_v14  ;;  %v2977_v51 = vpop.eup %2976  ;;  %v1330_v14 = vld [vmem:[%s3793_s0 + $0x5] sm:$0x1] }
 0x326   :  { %v858_v1 = vadd.f32 1.0, %v2977_v51  ;;  %v912_v51 = vpop.permute.xlu0 %911 }
 0x327   :  { %2978 = vrcp.f32 %v857_v25  ;;  %v3823_v25 = vmov 0   ;;  %v917_v47 = vmul.f32 %v912_v51, %v3270_v48 }
 0x328   :  { %2980 = vrcp.f32 %v858_v1  ;;  %2949 = vset.pattern.permute.xlu0 %v3823_v25  ;;  %v908_v1 = vpop.permute.xlu1 %907 }
 0x331   :  { %v2979_v50 = vpop.eup %2978 }
 0x332   :  { %v863_v56 = vmul.f32 %v2979_v50, %v846_v61  ;;  %v2981_v53 = vpop.eup %2980  ;;  %v883_v61 = vmul.f32 %v875_v42, %v3267_v44  ;;  %v918_v50 = vmul.f32 %v912_v51, %v3273_v52 }
 0x333   :  { %v866_v62 = vsub.f32 1.0, %v2981_v53  ;;  %v868_v58 = vmul.f32 %v2981_v53, %v3403_v10  ;;  %v1101_v10 = vld [vmem:[%s3793_s0 + $0xc] sm:$0x1] }
 0x334   :  { %v864_v33 = vadd.f32 %v863_v56, %v707_v60  ;;  %1109 = vperm.xlu1 %2942, %v1101_v10   ;;  %v926_v60 = vrot.slane %v917_v47, 7  ;;  %v914_v56 = vmul.f32 %v908_v1, %v3270_v48  ;;  %v928_v53 = vrot.slane %v918_v50, 7 }
 0x336   :  { %2982 = vtanh.f32 %v864_v33  ;;  %v895_v33 = vsel %vm161_vm1, %v894_v29, %v882_v36 }
 0x338   :  { %2944 = vset.pattern.permute.xlu1 %v3822_v13 }
 0x339   :  { %1141 = vperm.xlu1 %2944, %v1101_v10   ;;  %v927_v10 = vsel %vm161_vm1, %v926_v60, %v914_v56 }
 0x33d   :  { %1137 = vperm.xlu1 %2944, %v1100_v30  }
 0x340   :  { %v2983_v19 = vpop.eup %2982 }
 0x341   :  { %v867_v46 = vmul.f32 %v2983_v19, %v866_v62  ;;  %2945 = vset.pattern.permute.xlu1 %v3823_v25  ;;  %v915_v62 = vmul.f32 %v908_v1, %v3273_v52  ;;  %v3824_v19 = vld [vmem:[#allocation6_spill] sm:$0xff] }
 0x342   :  { %1334 = vperm.xlu1 %2945, %v1330_v14  }
 0x343   :  { %v3467_v32 = vadd.f32 %v868_v58, %v867_v46  ;;  %v903_v46 = vadd.f32 %v895_v33, %v3824_v19  ;;  %v897_v58 = vsel %vm161_vm1, %v896_v57, %v883_v61  ;;  %v929_v47 = vsel %vm161_vm1, %v928_v53, %v915_v62 }
 0x344   :  { %v887_v61 = vmul.f32 %v880_v0, %v3303_v37  ;;  %v919_v53 = vmul.f32 %v912_v51, %v3306_v27 }
 0x345   :  { %1003 = vmatmul.mubr.f32.vlgmr.msra.gmra.mrb[6].mxu0 %v3467_v32  ;;  %2333 = vmatmul.mubr.f32.vlgmr.msra.gmra.mrb[6].mxu1 %v3467_v32  ;;  %v935_v38 = vadd.f32 %v927_v10, %v903_v46 }
 0x346   :  { %2702 = vmatpush1.bf16.msra.mxu0 %v3126_v11  ;;  %2733 = vmatpush3.bf16.msra.mxu1 %v3143_v31  ;;  %v898_v46 = vrot.slane %v887_v61, 7  ;;  %v930_v10 = vrot.slane %v919_v53, 7 }
 0x347   :  { %2704 = vmatprep.subr.bf16.mxu0 %v3128_v12  ;;  %2734 = vmatprep.subr.bf16.mxu1 %v3816_v6 }
 0x348   :  { %1232 = vmatprep.mubr.f32.mxu0 %v3817_v63  ;;  %2367 = vmatprep.mubr.msk.f32.mxu1 %vm3063_vm0, %v3817_v63 }
 0x349   :  { %2947 = vset.pattern.permute.xlu1 %v3822_v13 }
 0x34a   :  { %2706 = vmatpush1.bf16.msra.mxu0 %v3132_v17  ;;  %2736 = vmatpush3.bf16.msra.mxu1 %v3152_v39 }
 0x34b   :  { %2708 = vmatprep.subr.bf16.mxu0 %v3135_v18  ;;  %2737 = vmatprep.subr.bf16.mxu1 %v3816_v6 }
 0x34c   :  { %1367 = vperm.xlu1 %2947, %v1330_v14   ;;  %v904_v14 = vadd.f32 %v897_v58, %v3291_v22  ;;  %v884_v58 = vmul.f32 %v875_v42, %v3303_v37 }
 0x34e   :  { %2710 = vmatpush1.bf16.msra.mxu0 %v3138_v23  ;;  %2739 = vmatpush3.bf16.msra.mxu1 %v3165_v49  ;;  %v936_v13 = vadd.f32 %v929_v47, %v904_v14 }
 0x34f   :  { %2712 = vmatprep.subr.bf16.mxu0 %v3141_v24  ;;  %2740 = vmatprep.subr.bf16.mxu1 %v3816_v6 }
 0x350   :  { %2948 = vset.pattern.permute.xlu1 %v3823_v25 }
 0x352   :  { %2714 = vmatpush1.bf16.msra.mxu0 %v3146_v34  ;;  %2742 = vmatpush3.bf16.msra.mxu1 %v3178_v59 }
 0x353   :  { %2716 = vmatprep.subr.bf16.mxu0 %v3149_v35  ;;  %2743 = vmatprep.subr.bf16.mxu1 %v3816_v6 }
 0x356   :  { %2718 = vmatpush1.bf16.msra.mxu0 %v3156_v43  ;;  %2745 = vmatpush3.bf16.msra.mxu1 %v3191_v9 }
 0x357   :  { %2720 = vmatprep.subr.bf16.mxu0 %v3162_v45  ;;  %2746 = vmatprep.subr.bf16.mxu1 %v3816_v6 }
 0x35a   :  { %2722 = vmatpush1.bf16.msra.mxu0 %v3172_v54  ;;  %2748 = vmatpush3.bf16.msra.mxu1 %v3203_v16 }
 0x35b   :  { %2724 = vmatprep.subr.bf16.mxu0 %v3175_v55  ;;  %2749 = vmatprep.subr.bf16.mxu1 %v3816_v6 }
 0x35e   :  { %2726 = vmatpush1.bf16.msra.mxu0 %v3185_v4  ;;  %2751 = vmatpush3.bf16.msra.mxu1 %v3210_v21 }
 0x35f   :  { %2728 = vmatprep.subr.bf16.mxu0 %v3188_v5  ;;  %2752 = vmatprep.subr.bf16.mxu1 %v3816_v6 }
 0x362   :  { %2730 = vmatpush1.bf16.msra.mxu0 %v3199_v15  ;;  %2754 = vmatpush3.bf16.msra.mxu1 %v3219_v26 }
 0x363   :  { %2756 = vmatprep.subr.bf16.mxu0 %v3124_v7  ;;  %2787 = vmatprep.subr.bf16.mxu1 %v3816_v6 }
 0x394   :  { %v1105_v61 = vpop.permute.xlu0 %1104 }
 0x418   :  { %v1004_v30 = vpop.f32.mrb[6].mxu0  ;;  %v1075_v8 = vpop.f32.mrb[6].mxu1 }
 0x419   :  { %v1005_v2 = vadd.f32 %v1004_v30, %v3289_v20  ;;  %v1006_v25 = vpop.f32.mrb[7].mxu0  ;;  %v2334_v29 = vpop.f32.mrb[7].mxu1  ;;  %v916_v30 = vmul.f32 %v908_v1, %v3306_v27  ;;  %v1076_v0 = vadd.f32 %v1075_v8, %v3314_v28 }
 0x41a   :  { %v1007_v36 = vadd.f32 %v1006_v25, %v3297_v41  ;;  %v899_v25 = vsel %vm161_vm1, %v898_v46, %v884_v58  ;;  %v1112_v58 = vmul.f32 %v1105_v61, %v3265_v40 }
 0x41b   :  { %v1079_v50 = vadd.f32 %v1005_v2, %v935_v38  ;;  %v931_v14 = vsel %vm161_vm1, %v930_v10, %v916_v30  ;;  %v1113_v10 = vmul.f32 %v1105_v61, %v3267_v44 }
 0x41c   :  { %v1080_v19 = vadd.f32 %v1007_v36, %v936_v13  ;;  %v905_v13 = vadd.f32 %v899_v25, %v3311_v3 }
 0x41d   :  { %v2048_v33 = vmul.f32 -1.442695, %v1079_v50 }
 0x41e   :  { %v2049_v57 = vmul.f32 -1.442695, %v1080_v19  ;;  %v937_v2 = vadd.f32 %v931_v14, %v905_v13 }
 0x41f   :  { %2984 = vpow2.f32 %v2048_v33 }
 0x420   :  { %2986 = vpow2.f32 %v2049_v57 }
 0x429   :  { %v2985_v60 = vpop.eup %2984 }
 0x42a   :  { %v1087_v56 = vadd.f32 1.0, %v2985_v60  ;;  %v2987_v62 = vpop.eup %2986 }
 0x42b   :  { %v1088_v19 = vadd.f32 1.0, %v2987_v62 }
 0x42c   :  { %2988 = vrcp.f32 %v1087_v56 }
 0x42d   :  { %2990 = vrcp.f32 %v1088_v19 }
 0x436   :  { %v2989_v38 = vpop.eup %2988 }
 0x437   :  { %v1093_v47 = vmul.f32 %v2989_v38, %v1076_v0  ;;  %v2991_v51 = vpop.eup %2990  ;;  %v3825_v38 = vld [vmem:[#allocation6_spill] sm:$0xff] }
 0x438   :  { %v1096_v29 = vsub.f32 1.0, %v2991_v51  ;;  %v1098_v33 = vmul.f32 %v2991_v51, %v3467_v32  ;;  %v1110_v32 = vpop.permute.xlu1 %1109 }
 0x439   :  { %v1094_v42 = vadd.f32 %v1093_v47, %v937_v2  ;;  %v1115_v57 = vmul.f32 %v1110_v32, %v3265_v40  ;;  %v1116_v60 = vmul.f32 %v1110_v32, %v3267_v44 }
 0x43b   :  { %2992 = vtanh.f32 %v1094_v42  ;;  %v1124_v56 = vrot.slane %v1115_v57, 7  ;;  %v1126_v62 = vrot.slane %v1116_v60, 7 }
 0x43c   :  { %v1142_v8 = vpop.permute.xlu1 %1141 }
 0x43d   :  { %v1147_v46 = vmul.f32 %v1142_v8, %v3270_v48  ;;  %v1148_v25 = vmul.f32 %v1142_v8, %v3273_v52  ;;  %v1125_v19 = vsel %vm161_vm1, %v1124_v56, %v1112_v58  ;;  %v1127_v47 = vsel %vm161_vm1, %v1126_v62, %v1113_v10 }
 0x43e   :  { %v1133_v2 = vadd.f32 %v1125_v19, %v3825_v38  ;;  %v1117_v10 = vmul.f32 %v1110_v32, %v3303_v37 }
 0x43f   :  { %v1156_v30 = vrot.slane %v1147_v46, 7  ;;  %v1158_v14 = vrot.slane %v1148_v25, 7 }
 0x440   :  { %v1138_v53 = vpop.permute.xlu1 %1137 }
 0x441   :  { %v1144_v13 = vmul.f32 %v1138_v53, %v3270_v48  ;;  %v1145_v0 = vmul.f32 %v1138_v53, %v3273_v52 }
 0x443   :  { %v1157_v42 = vsel %vm161_vm1, %v1156_v30, %v1144_v13  ;;  %v1159_v57 = vsel %vm161_vm1, %v1158_v14, %v1145_v0  ;;  %v1114_v14 = vmul.f32 %v1105_v61, %v3303_v37 }
 0x445   :  { %v2993_v36 = vpop.eup %2992 }
 0x446   :  { %v1097_v50 = vmul.f32 %v2993_v36, %v1096_v29  ;;  %v1134_v36 = vadd.f32 %v1127_v47, %v3291_v22  ;;  %v1149_v47 = vmul.f32 %v1142_v8, %v3306_v27 }
 0x448   :  { %v3549_v1 = vadd.f32 %v1098_v33, %v1097_v50  ;;  %v1165_v50 = vadd.f32 %v1157_v42, %v1133_v2  ;;  %v1166_v25 = vadd.f32 %v1159_v57, %v1134_v36  ;;  %v1128_v2 = vrot.slane %v1117_v10, 7 }
 0x449   :  { %v1160_v42 = vrot.slane %v1149_v47, 7  ;;  %v1146_v36 = vmul.f32 %v1138_v53, %v3306_v27  ;;  %v3826_v10 = vmov 1  }
 0x44a   :  { %1233 = vmatmul.mubr.f32.vlgmr.msra.gmra.mrb[8].mxu0 %v3549_v1  ;;  %2368 = vmatmul.mubr.f32.vlgmr.msra.gmra.mrb[8].mxu1 %v3549_v1 }
 0x44b   :  { %2758 = vmatpush1.bf16.msra.mxu0 %v3126_v11  ;;  %2789 = vmatpush3.bf16.msra.mxu1 %v3143_v31 }
 0x44c   :  { %2760 = vmatprep.subr.bf16.mxu0 %v3128_v12  ;;  %2790 = vmatprep.subr.bf16.mxu1 %v3816_v6 }
 0x44d   :  { %1462 = vmatprep.mubr.f32.mxu0 %v3817_v63  ;;  %2402 = vmatprep.mubr.msk.f32.mxu1 %vm3063_vm0, %v3817_v63 }
 0x44f   :  { %2762 = vmatpush1.bf16.msra.mxu0 %v3132_v17  ;;  %2792 = vmatpush3.bf16.msra.mxu1 %v3152_v39 }
 0x450   :  { %2764 = vmatprep.subr.bf16.mxu0 %v3135_v18  ;;  %2793 = vmatprep.subr.bf16.mxu1 %v3816_v6 }
 0x453   :  { %2766 = vmatpush1.bf16.msra.mxu0 %v3138_v23  ;;  %2795 = vmatpush3.bf16.msra.mxu1 %v3165_v49 }
 0x454   :  { %2768 = vmatprep.subr.bf16.mxu0 %v3141_v24  ;;  %2796 = vmatprep.subr.bf16.mxu1 %v3816_v6 }
 0x457   :  { %2770 = vmatpush1.bf16.msra.mxu0 %v3146_v34  ;;  %2798 = vmatpush3.bf16.msra.mxu1 %v3178_v59 }
 0x458   :  { %2772 = vmatprep.subr.bf16.mxu0 %v3149_v35  ;;  %2799 = vmatprep.subr.bf16.mxu1 %v3816_v6 }
 0x45b   :  { %2774 = vmatpush1.bf16.msra.mxu0 %v3156_v43  ;;  %2801 = vmatpush3.bf16.msra.mxu1 %v3191_v9 }
 0x45c   :  { %2776 = vmatprep.subr.bf16.mxu0 %v3162_v45  ;;  %2802 = vmatprep.subr.bf16.mxu1 %v3816_v6 }
 0x45f   :  { %2778 = vmatpush1.bf16.msra.mxu0 %v3172_v54  ;;  %2804 = vmatpush3.bf16.msra.mxu1 %v3203_v16 }
 0x460   :  { %2780 = vmatprep.subr.bf16.mxu0 %v3175_v55  ;;  %2805 = vmatprep.subr.bf16.mxu1 %v3816_v6 }
 0x463   :  { %2782 = vmatpush1.bf16.msra.mxu0 %v3185_v4  ;;  %2807 = vmatpush3.bf16.msra.mxu1 %v3210_v21 }
 0x464   :  { %2784 = vmatprep.subr.bf16.mxu0 %v3188_v5  ;;  %2808 = vmatprep.subr.bf16.mxu1 %v3816_v6 }
 0x467   :  { %2786 = vmatpush1.bf16.msra.mxu0 %v3199_v15  ;;  %2810 = vmatpush3.bf16.msra.mxu1 %v3219_v26 }
 0x468   :  { %2812 = vmatprep.subr.bf16.mxu0 %v3124_v7  ;;  %2843 = vmatprep.subr.bf16.mxu1 %v3816_v6 }
 0x51d   :  { %v1234_v51 = vpop.f32.mrb[8].mxu0  ;;  %v1305_v29 = vpop.f32.mrb[8].mxu1 }
 0x51e   :  { %v1235_v33 = vadd.f32 %v1234_v51, %v3289_v20  ;;  %v1236_v60 = vpop.f32.mrb[9].mxu0  ;;  %v2369_v56 = vpop.f32.mrb[9].mxu1  ;;  %v1129_v51 = vsel %vm161_vm1, %v1128_v2, %v1114_v14  ;;  %v1306_v32 = vadd.f32 %v1305_v29, %v3314_v28  ;;  %v1560_v29 = vld [vmem:[%s3793_s0 + $0x6] sm:$0x1] }
 0x51f   :  { %v1237_v46 = vadd.f32 %v1236_v60, %v3297_v41  ;;  %1564 = vperm.xlu0 %2949, %v1560_v29   ;;  %v1335_v2 = vpop.permute.xlu1 %1334 }
 0x520   :  { %v1309_v58 = vadd.f32 %v1235_v33, %v1165_v50  ;;  %v1135_v50 = vadd.f32 %v1129_v51, %v3311_v3  ;;  %v1161_v33 = vsel %vm161_vm1, %v1160_v42, %v1146_v36  ;;  %v1342_v51 = vmul.f32 %v1335_v2, %v3265_v40 }
 0x521   :  { %v1310_v38 = vadd.f32 %v1237_v46, %v1166_v25 }
 0x522   :  { %v2050_v19 = vmul.f32 -1.442695, %v1309_v58  ;;  %v1167_v60 = vadd.f32 %v1161_v33, %v1135_v50  ;;  %v1343_v33 = vmul.f32 %v1335_v2, %v3267_v44 }
 0x523   :  { %v2051_v62 = vmul.f32 -1.442695, %v1310_v38  ;;  %v1368_v50 = vpop.permute.xlu1 %1367 }
 0x524   :  { %2994 = vpow2.f32 %v2050_v19 }
 0x525   :  { %2996 = vpow2.f32 %v2051_v62  ;;  %v1791_v62 = vld [vmem:[%s3793_s0 + $0xf] sm:$0x1] }
 0x526   :  { %1799 = vperm.xlu0 %2949, %v1791_v62  }
 0x52a   :  { %2952 = vset.pattern.permute.xlu0 %v3826_v10 }
 0x52b   :  { %1831 = vperm.xlu0 %2952, %v1791_v62  }
 0x52e   :  { %v2995_v30 = vpop.eup %2994 }
 0x52f   :  { %v1317_v13 = vadd.f32 1.0, %v2995_v30  ;;  %v2997_v0 = vpop.eup %2996  ;;  %v3827_v30 = vmov 0  }
 0x530   :  { %v1318_v38 = vadd.f32 1.0, %v2997_v0 }
 0x531   :  { %2998 = vrcp.f32 %v1317_v13  ;;  %v1340_v13 = vpop.permute.xlu0 %1339 }
 0x532   :  { %3000 = vrcp.f32 %v1318_v38  ;;  %v1345_v47 = vmul.f32 %v1340_v13, %v3265_v40  ;;  %v1346_v0 = vmul.f32 %v1340_v13, %v3267_v44 }
 0x534   :  { %v1354_v42 = vrot.slane %v1345_v47, 7  ;;  %v1356_v38 = vrot.slane %v1346_v0, 7 }
 0x535   :  { %v1372_v14 = vpop.permute.xlu0 %1371 }
 0x536   :  { %v1377_v36 = vmul.f32 %v1372_v14, %v3270_v48 }
 0x53b   :  { %v2999_v57 = vpop.eup %2998 }
 0x53c   :  { %v1323_v56 = vmul.f32 %v2999_v57, %v1306_v32  ;;  %v3001_v61 = vpop.eup %3000  ;;  %v1378_v32 = vmul.f32 %v1372_v14, %v3273_v52  ;;  %v1386_v57 = vrot.slane %v1377_v36, 7 }
 0x53d   :  { %v1326_v46 = vsub.f32 1.0, %v3001_v61  ;;  %v1328_v19 = vmul.f32 %v3001_v61, %v3549_v1  ;;  %v1561_v1 = vld [vmem:[%s3793_s0 + $0xe] sm:$0x1]  ;;  %v1375_v61 = vmul.f32 %v1368_v50, %v3273_v52 }
 0x53e   :  { %v1324_v8 = vadd.f32 %v1323_v56, %v1167_v60  ;;  %1569 = vperm.xlu1 %2948, %v1561_v1   ;;  %v1374_v60 = vmul.f32 %v1368_v50, %v3270_v48  ;;  %v1355_v56 = vsel %vm161_vm1, %v1354_v42, %v1342_v51 }
 0x540   :  { %3002 = vtanh.f32 %v1324_v8  ;;  %v1388_v8 = vrot.slane %v1378_v32, 7 }
 0x542   :  { %2950 = vset.pattern.permute.xlu1 %v3826_v10 }
 0x543   :  { %1601 = vperm.xlu1 %2950, %v1561_v1  }
 0x547   :  { %1597 = vperm.xlu1 %2950, %v1560_v29  }
 0x54a   :  { %v3003_v58 = vpop.eup %3002 }
 0x54b   :  { %v1327_v25 = vmul.f32 %v3003_v58, %v1326_v46  ;;  %2951 = vset.pattern.permute.xlu1 %v3827_v30  ;;  %v3828_v46 = vld [vmem:[#allocation6_spill] sm:$0xff]  ;;  %v1389_v30 = vsel %vm161_vm1, %v1388_v8, %v1375_v61  ;;  %v1379_v8 = vmul.f32 %v1372_v14, %v3306_v27 }
 0x54c   :  { %v1363_v58 = vadd.f32 %v1355_v56, %v3828_v46 }
 0x54d   :  { %v3613_v53 = vadd.f32 %v1328_v19, %v1327_v25  ;;  %v1357_v25 = vsel %vm161_vm1, %v1356_v38, %v1343_v33  ;;  %v1387_v19 = vsel %vm161_vm1, %v1386_v57, %v1374_v60  ;;  %v1347_v33 = vmul.f32 %v1340_v13, %v3303_v37 }
 0x54e   :  { %v1364_v62 = vadd.f32 %v1357_v25, %v3291_v22  ;;  %v1344_v25 = vmul.f32 %v1335_v2, %v3303_v37 }
 0x54f   :  { %1463 = vmatmul.mubr.f32.vlgmr.msra.gmra.mrb[10].mxu0 %v3613_v53  ;;  %2403 = vmatmul.mubr.f32.vlgmr.msra.gmra.mrb[10].mxu1 %v3613_v53 }
 0x550   :  { %2814 = vmatpush1.bf16.msra.mxu0 %v3126_v11  ;;  %2845 = vmatpush3.bf16.msra.mxu1 %v3143_v31  ;;  %v1396_v36 = vadd.f32 %v1389_v30, %v1364_v62  ;;  %v1376_v62 = vmul.f32 %v1368_v50, %v3306_v27 }
 0x551   :  { %2816 = vmatprep.subr.bf16.mxu0 %v3128_v12  ;;  %2846 = vmatprep.subr.bf16.mxu1 %v3816_v6 }
 0x552   :  { %1692 = vmatprep.mubr.f32.mxu0 %v3817_v63  ;;  %2437 = vmatprep.mubr.msk.f32.mxu1 %vm3063_vm0, %v3817_v63 }
 0x554   :  { %2818 = vmatpush1.bf16.msra.mxu0 %v3132_v17  ;;  %2848 = vmatpush3.bf16.msra.mxu1 %v3152_v39 }
 0x555   :  { %2820 = vmatprep.subr.bf16.mxu0 %v3135_v18  ;;  %2849 = vmatprep.subr.bf16.mxu1 %v3816_v6 }
 0x558   :  { %2822 = vmatpush1.bf16.msra.mxu0 %v3138_v23  ;;  %2851 = vmatpush3.bf16.msra.mxu1 %v3165_v49 }
 0x559   :  { %2824 = vmatprep.subr.bf16.mxu0 %v3141_v24  ;;  %2852 = vmatprep.subr.bf16.mxu1 %v3816_v6 }
 0x55c   :  { %2826 = vmatpush1.bf16.msra.mxu0 %v3146_v34  ;;  %2854 = vmatpush3.bf16.msra.mxu1 %v3178_v59 }
 0x55d   :  { %2828 = vmatprep.subr.bf16.mxu0 %v3149_v35  ;;  %2855 = vmatprep.subr.bf16.mxu1 %v3816_v6 }
 0x560   :  { %2830 = vmatpush1.bf16.msra.mxu0 %v3156_v43  ;;  %2857 = vmatpush3.bf16.msra.mxu1 %v3191_v9 }
 0x561   :  { %2832 = vmatprep.subr.bf16.mxu0 %v3162_v45  ;;  %2858 = vmatprep.subr.bf16.mxu1 %v3816_v6 }
 0x564   :  { %2834 = vmatpush1.bf16.msra.mxu0 %v3172_v54  ;;  %2860 = vmatpush3.bf16.msra.mxu1 %v3203_v16 }
 0x565   :  { %2836 = vmatprep.subr.bf16.mxu0 %v3175_v55  ;;  %2861 = vmatprep.subr.bf16.mxu1 %v3816_v6 }
 0x568   :  { %2838 = vmatpush1.bf16.msra.mxu0 %v3185_v4  ;;  %2863 = vmatpush3.bf16.msra.mxu1 %v3210_v21 }
 0x569   :  { %2840 = vmatprep.subr.bf16.mxu0 %v3188_v5  ;;  %2864 = vmatprep.subr.bf16.mxu1 %v3816_v6 }
 0x56c   :  { %2842 = vmatpush1.bf16.msra.mxu0 %v3199_v15  ;;  %2866 = vmatpush3.bf16.msra.mxu1 %v3219_v26 }
 0x56d   :  { %2868 = vmatprep.subr.bf16.mxu0 %v3124_v7  ;;  %2899 = vmatprep.subr.bf16.mxu1 %v3816_v6  ;;  %v1790_v7 = vld [vmem:[%s3793_s0 + $0x7] sm:$0x1] }
 0x56e   :  { %1794 = vperm.xlu1 %2951, %v1790_v7  }
 0x572   :  { %2953 = vset.pattern.permute.xlu1 %v3826_v10  ;;  %v1395_v10 = vadd.f32 %v1387_v19, %v1363_v58  ;;  %v1358_v58 = vrot.slane %v1347_v33, 7 }
 0x573   :  { %1827 = vperm.xlu1 %2953, %v1790_v7  }
 0x574   :  { %v1359_v19 = vsel %vm161_vm1, %v1358_v58, %v1344_v25 }
 0x622   :  { %v1464_v1 = vpop.f32.mrb[10].mxu0  ;;  %v1535_v29 = vpop.f32.mrb[10].mxu1 }
 0x623   :  { %v1465_v7 = vadd.f32 %v1464_v1, %v3289_v20  ;;  %v1466_v47 = vpop.f32.mrb[11].mxu0  ;;  %v2404_v0 = vpop.f32.mrb[11].mxu1  ;;  %v1390_v1 = vrot.slane %v1379_v8, 7  ;;  %v1536_v13 = vadd.f32 %v1535_v29, %v3314_v28 }
 0x624   :  { %v1467_v42 = vadd.f32 %v1466_v47, %v3297_v41 }
 0x625   :  { %v1539_v51 = vadd.f32 %v1465_v7, %v1395_v10  ;;  %v1365_v10 = vadd.f32 %v1359_v19, %v3311_v3  ;;  %v1391_v30 = vsel %vm161_vm1, %v1390_v1, %v1376_v62 }
 0x626   :  { %v1540_v56 = vadd.f32 %v1467_v42, %v1396_v36 }
 0x627   :  { %v2052_v32 = vmul.f32 -1.442695, %v1539_v51  ;;  %v1397_v0 = vadd.f32 %v1391_v30, %v1365_v10 }
 0x628   :  { %v2053_v38 = vmul.f32 -1.442695, %v1540_v56 }
 0x629   :  { %3004 = vpow2.f32 %v2052_v32 }
 0x62a   :  { %3006 = vpow2.f32 %v2053_v38 }
 0x633   :  { %v3005_v57 = vpop.eup %3004 }
 0x634   :  { %v1547_v60 = vadd.f32 1.0, %v3005_v57  ;;  %v3007_v61 = vpop.eup %3006 }
 0x635   :  { %v1548_v7 = vadd.f32 1.0, %v3007_v61 }
 0x636   :  { %3008 = vrcp.f32 %v1547_v60 }
 0x637   :  { %3010 = vrcp.f32 %v1548_v7 }
 0x640   :  { %v3009_v47 = vpop.eup %3008 }
 0x641   :  { %v1553_v42 = vmul.f32 %v3009_v47, %v1536_v13  ;;  %v3011_v14 = vpop.eup %3010 }
 0x642   :  { %v1556_v51 = vsub.f32 1.0, %v3011_v14  ;;  %v1558_v56 = vmul.f32 %v3011_v14, %v3613_v53 }
 0x643   :  { %v1554_v2 = vadd.f32 %v1553_v42, %v1397_v0 }
 0x645   :  { %3012 = vtanh.f32 %v1554_v2 }
 0x64f   :  { %v3013_v36 = vpop.eup %3012 }
 0x650   :  { %v1557_v32 = vmul.f32 %v3013_v36, %v1556_v51 }
 0x652   :  { %v3693_v50 = vadd.f32 %v1558_v56, %v1557_v32 }
 0x654   :  { %1693 = vmatmul.mubr.f32.vlgmr.msra.gmra.mrb[12].mxu0 %v3693_v50  ;;  %2438 = vmatmul.mubr.f32.vlgmr.msra.gmra.mrb[12].mxu1 %v3693_v50 }
 0x655   :  { %2870 = vmatpush1.bf16.msra.mxu0 %v3126_v11  ;;  %2901 = vmatpush3.bf16.msra.mxu1 %v3143_v31  ;;  %v1570_v11 = vpop.permute.xlu1 %1569 }
 0x656   :  { %2872 = vmatprep.subr.bf16.mxu0 %v3128_v12  ;;  %2902 = vmatprep.subr.bf16.mxu1 %v3816_v6  ;;  %v1577_v61 = vmul.f32 %v1570_v11, %v3303_v37 }
 0x657   :  { %1922 = vmatprep.mubr.f32.mxu0 %v3817_v63  ;;  %2472 = vmatprep.mubr.msk.f32.mxu1 %vm3063_vm0, %v3817_v63 }
 0x658   :  { %v1588_v62 = vrot.slane %v1577_v61, 7 }
 0x659   :  { %2874 = vmatpush1.bf16.msra.mxu0 %v3132_v17  ;;  %2904 = vmatpush3.bf16.msra.mxu1 %v3152_v39  ;;  %v1602_v12 = vpop.permute.xlu1 %1601  ;;  %v1575_v17 = vmul.f32 %v1570_v11, %v3265_v40 }
 0x65a   :  { %2876 = vmatprep.subr.bf16.mxu0 %v3135_v18  ;;  %2905 = vmatprep.subr.bf16.mxu1 %v3816_v6  ;;  %v1565_v18 = vpop.permute.xlu0 %1564  ;;  %v1607_v31 = vmul.f32 %v1602_v12, %v3270_v48  ;;  %v1609_v10 = vmul.f32 %v1602_v12, %v3306_v27 }
 0x65b   :  { %v1574_v7 = vmul.f32 %v1565_v18, %v3303_v37 }
 0x65c   :  { %v1620_v13 = vrot.slane %v1609_v10, 7 }
 0x65d   :  { %2878 = vmatpush1.bf16.msra.mxu0 %v3138_v23  ;;  %2907 = vmatpush3.bf16.msra.mxu1 %v3165_v49  ;;  %v1576_v23 = vmul.f32 %v1570_v11, %v3267_v44  ;;  %v1616_v49 = vrot.slane %v1607_v31, 7  ;;  %v1589_v47 = vsel %vm161_vm1, %v1588_v62, %v1574_v7 }
 0x65e   :  { %2880 = vmatprep.subr.bf16.mxu0 %v3141_v24  ;;  %2908 = vmatprep.subr.bf16.mxu1 %v3816_v6  ;;  %v1584_v24 = vrot.slane %v1575_v17, 7  ;;  %v1595_v42 = vadd.f32 %v1589_v47, %v3311_v3 }
 0x65f   :  { %v1586_v39 = vrot.slane %v1576_v23, 7 }
 0x661   :  { %2882 = vmatpush1.bf16.msra.mxu0 %v3146_v34  ;;  %2910 = vmatpush3.bf16.msra.mxu1 %v3178_v59  ;;  %v1572_v34 = vmul.f32 %v1565_v18, %v3265_v40 }
 0x662   :  { %2884 = vmatprep.subr.bf16.mxu0 %v3149_v35  ;;  %2911 = vmatprep.subr.bf16.mxu1 %v3816_v6  ;;  %v1598_v35 = vpop.permute.xlu1 %1597 }
 0x663   :  { %v1606_v0 = vmul.f32 %v1598_v35, %v3306_v27 }
 0x665   :  { %2886 = vmatpush1.bf16.msra.mxu0 %v3156_v43  ;;  %2913 = vmatpush3.bf16.msra.mxu1 %v3191_v9  ;;  %v1608_v43 = vmul.f32 %v1602_v12, %v3273_v52  ;;  %v1621_v14 = vsel %vm161_vm1, %v1620_v13, %v1606_v0 }
 0x666   :  { %2888 = vmatprep.subr.bf16.mxu0 %v3162_v45  ;;  %2914 = vmatprep.subr.bf16.mxu1 %v3816_v6  ;;  %v1573_v45 = vmul.f32 %v1565_v18, %v3267_v44  ;;  %v1627_v32 = vadd.f32 %v1621_v14, %v1595_v42 }
 0x667   :  { %v1618_v59 = vrot.slane %v1608_v43, 7 }
 0x668   :  { %v1587_v9 = vsel %vm161_vm1, %v1586_v39, %v1573_v45 }
 0x669   :  { %2890 = vmatpush1.bf16.msra.mxu0 %v3172_v54  ;;  %2916 = vmatpush3.bf16.msra.mxu1 %v3203_v16  ;;  %v1604_v54 = vmul.f32 %v1598_v35, %v3270_v48 }
 0x66a   :  { %2892 = vmatprep.subr.bf16.mxu0 %v3175_v55  ;;  %2917 = vmatprep.subr.bf16.mxu1 %v3816_v6  ;;  %v1585_v55 = vsel %vm161_vm1, %v1584_v24, %v1572_v34  ;;  %v1800_v34 = vpop.permute.xlu0 %1799 }
 0x66b   :  { %v1805_v39 = vmul.f32 %v1800_v34, %v3265_v40  ;;  %v1806_v45 = vmul.f32 %v1800_v34, %v3267_v44 }
 0x66d   :  { %2894 = vmatpush1.bf16.msra.mxu0 %v3185_v4  ;;  %2919 = vmatpush3.bf16.msra.mxu1 %v3210_v21  ;;  %v1605_v4 = vmul.f32 %v1598_v35, %v3273_v52  ;;  %v1795_v35 = vpop.permute.xlu1 %1794 }
 0x66e   :  { %2896 = vmatprep.subr.bf16.mxu0 %v3188_v5  ;;  %2920 = vmatprep.subr.bf16.mxu1 %v3816_v6  ;;  %v1593_v5 = vadd.f32 %v1585_v55, %v3828_v46  ;;  %v1832_v43 = vpop.permute.xlu0 %1831 }
 0x66f   :  { %v1619_v53 = vsel %vm161_vm1, %v1618_v59, %v1605_v4  ;;  %v1837_v55 = vmul.f32 %v1832_v43, %v3270_v48  ;;  %v1803_v4 = vmul.f32 %v1795_v35, %v3267_v44  ;;  %v1839_v10 = vmul.f32 %v1832_v43, %v3306_v27 }
 0x671   :  { %2898 = vmatpush1.bf16.msra.mxu0 %v3199_v15  ;;  %2922 = vmatpush3.bf16.msra.mxu1 %v3219_v26  ;;  %v1617_v15 = vsel %vm161_vm1, %v1616_v49, %v1604_v54  ;;  %v1594_v26 = vadd.f32 %v1587_v9, %v3291_v22  ;;  %v1814_v49 = vrot.slane %v1805_v39, 7  ;;  %v1802_v54 = vmul.f32 %v1795_v35, %v3265_v40  ;;  %v1828_v59 = vpop.permute.xlu1 %1827 }
 0x672   :  { %v1625_v6 = vadd.f32 %v1617_v15, %v1593_v5  ;;  %v1838_v5 = vmul.f32 %v1832_v43, %v3273_v52  ;;  %v1846_v9 = vrot.slane %v1837_v55, 7  ;;  %v1834_v15 = vmul.f32 %v1828_v59, %v3270_v48 }
 0x673   :  { %v1626_v60 = vadd.f32 %v1619_v53, %v1594_v26  ;;  %v1835_v26 = vmul.f32 %v1828_v59, %v3273_v52  ;;  %v1836_v13 = vmul.f32 %v1828_v59, %v3306_v27  ;;  %v2058_v27 = vld [vmem:[%s3798_s5] ss:$0 sm:$0xff] }
 0x727   :  { %v1694_v16 = vpop.f32.mrb[12].mxu0  ;;  %v1765_v21 = vpop.f32.mrb[12].mxu1 }
 0x728   :  { %v1695_v63 = vadd.f32 %v1694_v16, %v3289_v20  ;;  %v1696_v29 = vpop.f32.mrb[13].mxu0  ;;  %v2439_v38 = vpop.f32.mrb[13].mxu1  ;;  %v1766_v51 = vadd.f32 %v1765_v21, %v3314_v28  ;;  %v1815_v16 = vsel %vm161_vm1, %v1814_v49, %v1802_v54  ;;  %v1848_v21 = vrot.slane %v1838_v5, 7 }
 0x729   :  { %v1697_v33 = vadd.f32 %v1696_v29, %v3297_v41 }
 0x72a   :  { %v1769_v57 = vadd.f32 %v1695_v63, %v1625_v6  ;;  %v1823_v6 = vadd.f32 %v1815_v16, %v3828_v46  ;;  %v1847_v63 = vsel %vm161_vm1, %v1846_v9, %v1834_v15  ;;  %v1849_v48 = vsel %vm161_vm1, %v1848_v21, %v1835_v26 }
 0x72b   :  { %v1770_v25 = vadd.f32 %v1697_v33, %v1626_v60 }
 0x72c   :  { %v2054_v58 = vmul.f32 -1.442695, %v1769_v57  ;;  %v1855_v38 = vadd.f32 %v1847_v63, %v1823_v6 }
 0x72d   :  { %v2055_v8 = vmul.f32 -1.442695, %v1770_v25 }
 0x72e   :  { %3014 = vpow2.f32 %v2054_v58 }
 0x72f   :  { %3016 = vpow2.f32 %v2055_v8 }
 0x738   :  { %v3015_v19 = vpop.eup %3014 }
 0x739   :  { %v1777_v1 = vadd.f32 1.0, %v3015_v19  ;;  %v3017_v30 = vpop.eup %3016  ;;  %v1807_v19 = vmul.f32 %v1800_v34, %v3303_v37 }
 0x73a   :  { %v1778_v2 = vadd.f32 1.0, %v3017_v30  ;;  %v1850_v30 = vrot.slane %v1839_v10, 7 }
 0x73b   :  { %3018 = vrcp.f32 %v1777_v1  ;;  %v1818_v62 = vrot.slane %v1807_v19, 7 }
 0x73c   :  { %3020 = vrcp.f32 %v1778_v2  ;;  %v1851_v42 = vsel %vm161_vm1, %v1850_v30, %v1836_v13 }
 0x745   :  { %v3019_v36 = vpop.eup %3018 }
 0x746   :  { %v1783_v56 = vmul.f32 %v3019_v36, %v1766_v51  ;;  %v3021_v12 = vpop.eup %3020 }
 0x747   :  { %v1786_v17 = vsub.f32 1.0, %v3021_v12  ;;  %v1788_v24 = vmul.f32 %v3021_v12, %v3693_v50  ;;  %v1816_v50 = vrot.slane %v1806_v45, 7 }
 0x748   :  { %v1784_v11 = vadd.f32 %v1783_v56, %v1627_v32 }
 0x749   :  { %v1817_v40 = vsel %vm161_vm1, %v1816_v50, %v1803_v4 }
 0x74a   :  { %3022 = vtanh.f32 %v1784_v11  ;;  %v1824_v44 = vadd.f32 %v1817_v40, %v3291_v22 }
 0x74c   :  { %v1856_v25 = vadd.f32 %v1849_v48, %v1824_v44 }
 0x754   :  { %v3023_v18 = vpop.eup %3022 }
 0x755   :  { %v1787_v23 = vmul.f32 %v3023_v18, %v1786_v17 }
 0x757   :  { %v3755_v31 = vadd.f32 %v1788_v24, %v1787_v23  ;;  %v2033_v23 = vstv %s3799_s6 }
 0x759   :  { %1923 = vmatmul.mubr.f32.vlgmr.msra.gmra.mrb[14].mxu0 %v3755_v31  ;;  %2473 = vmatmul.mubr.f32.vlgmr.msra.gmra.mrb[14].mxu1 %v3755_v31 }
 0x82c   :  { %v1924_v53 = vpop.f32.mrb[14].mxu0  ;;  %v1995_v29 = vpop.f32.mrb[14].mxu1 }
 0x82d   :  { %v1925_v33 = vadd.f32 %v1924_v53, %v3289_v20  ;;  %v1926_v57 = vpop.f32.mrb[15].mxu0  ;;  %v2474_v60 = vpop.f32.mrb[15].mxu1  ;;  %v1804_v20 = vmul.f32 %v1795_v35, %v3303_v37  ;;  %v1996_v2 = vadd.f32 %v1995_v29, %v3314_v28 }
 0x82e   :  { %v1927_v58 = vadd.f32 %v1926_v57, %v3297_v41 }
 0x82f   :  { %v1999_v52 = vadd.f32 %v1925_v33, %v1855_v38  ;;  %v1819_v41 = vsel %vm161_vm1, %v1818_v62, %v1804_v20 }
 0x830   :  { %v2000_v8 = vadd.f32 %v1927_v58, %v1856_v25  ;;  %v1825_v47 = vadd.f32 %v1819_v41, %v3311_v3 }
 0x831   :  { %v2056_v46 = vmul.f32 -1.442695, %v1999_v52 }
 0x832   :  { %v2057_v61 = vmul.f32 -1.442695, %v2000_v8  ;;  %v1857_v51 = vadd.f32 %v1851_v42, %v1825_v47 }
 0x833   :  { %3024 = vpow2.f32 %v2056_v46 }
 0x834   :  { %3026 = vpow2.f32 %v2057_v61 }
 0x83d   :  { %v3025_v1 = vpop.eup %3024 }
 0x83e   :  { %v2007_v22 = vadd.f32 1.0, %v3025_v1  ;;  %v3027_v7 = vpop.eup %3026 }
 0x83f   :  { %v2008_v0 = vadd.f32 1.0, %v3027_v7 }
 0x840   :  { %3028 = vrcp.f32 %v2007_v22 }
 0x841   :  { %3030 = vrcp.f32 %v2008_v0 }
 0x84a   :  { %v3029_v14 = vpop.eup %3028 }
 0x84b   :  { %v2013_v36 = vmul.f32 %v3029_v14, %v1996_v2  ;;  %v3031_v32 = vpop.eup %3030 }
 0x84c   :  { %v2016_v56 = vsub.f32 1.0, %v3031_v32  ;;  %v2018_v17 = vmul.f32 %v3031_v32, %v3755_v31 }
 0x84d   :  { %v2014_v37 = vadd.f32 %v2013_v36, %v1857_v51 }
 0x84f   :  { %3032 = vtanh.f32 %v2014_v37 }
 0x859   :  { %v3033_v11 = vpop.eup %3032 }
 0x85a   :  { %v2017_v12 = vmul.f32 %v3033_v11, %v2016_v56 }
 0x85c   :  { %v2019_v3 = vadd.f32 %v2018_v17, %v2017_v12 }
 0x85e   :  { %v2027_v18 = vmul.f32 %v2058_v27, %v2019_v3 }
 0x860   :  { %v2029_v28 = vsel %vm2028_vm2, %v2027_v18, 0.0 }
 0x861   :  { %2030 = vadd.xlane.f32.xlu1 %v2029_v28 }
 0x8ee   :  { %v2031_v24 = vpop.xlane.xlu1 %2030 }
 0x8ef   :  { %v2034_v34 = vadd.f32 %v2033_v23, %v2031_v24 }
 0x8f1   :  { %2036 = vst.msk [vmem:[%s3800_s7] sm:$0x3] %vm2035_vm3, %v2034_v34 }
 0x8f2   :  { %2041 = vsyncpa [#allocation4], 1 }

</bundles_post_ra>
